<compile_context>
chip_gen: v6e
topology: v6e:2x2x1
jax: 0.10.0
libtpu: 0.0.40
codegen_flags: <defaults>
</compile_context>

<pallas_src>
import numpy as np
import jax
import jax.numpy as jnp
from jax.experimental import pallas as pl
from jax.experimental.pallas import tpu as pltpu

INPUT_DIM = 2
UPPER_FREQ_INDEX = 10
REPEAT_W = INPUT_DIM * UPPER_FREQ_INDEX                       # 20
MAPPING_SIZE = INPUT_DIM * 2 * UPPER_FREQ_INDEX + INPUT_DIM   # 42
DEFAULT_TN = 2048  # lane tile (points per grid step), multiple of 128


def _pos_enc_kernel(x_ref, o_ref):
    # x_ref: (INPUT_DIM, bn)     VMEM, lane-dense (points along lanes)
    # o_ref: (MAPPING_SIZE, bn)  VMEM, lane-dense
    bn = x_ref.shape[1]
    x = x_ref[...]                                            # (2, bn)

    # scale[j] = pi * 2**(j % 10), j = 0..19  (torch's mismatched pairing).
    # Built in-kernel (no extra HBM input); integer shift keeps 2**f exact.
    row = jax.lax.broadcasted_iota(jnp.int32, (REPEAT_W, 1), 0)
    freq = row % UPPER_FREQ_INDEX
    scale = jnp.float32(np.pi) * jnp.left_shift(1, freq).astype(jnp.float32)

    # Row j of xr is x[j % 2] == torch's x.repeat(1, 10) column order.
    # Sublane replication only; the lane (point) axis is untouched.
    xr = jnp.broadcast_to(
        x[None, :, :], (UPPER_FREQ_INDEX, INPUT_DIM, bn)
    ).reshape(REPEAT_W, bn)
    s = xr * scale                                            # (20, bn)

    # Direct slice stores -- no concatenate temporary.
    o_ref[:INPUT_DIM, :] = x
    o_ref[INPUT_DIM:INPUT_DIM + REPEAT_W, :] = jnp.sin(s)
    o_ref[INPUT_DIM + REPEAT_W:, :] = jnp.cos(s)


def position_encoding(x, tn=DEFAULT_TN):
    """Pallas equivalent of PositionEncoding.forward (input_dim=2, F=10)."""
    x = jnp.asarray(x, jnp.float32)
    x_input = x[None, :] if x.ndim == 1 else x
    n, d = x_input.shape
    assert d == INPUT_DIM

    x_t = x_input.T                                           # (2, n) lane-dense

    if n <= tn:
        bn, grid_n = n, 1          # single full-extent block (any n allowed)
    else:
        bn, grid_n = tn, pl.cdiv(n, tn)  # ragged last block masked by Pallas

    out_t = pl.pallas_call(
        _pos_enc_kernel,
        out_shape=jax.ShapeDtypeStruct((MAPPING_SIZE, n), jnp.float32),
        grid_spec=pltpu.PrefetchScalarGridSpec(
            num_scalar_prefetch=0,
            grid=(grid_n,),
            in_specs=[pl.BlockSpec((INPUT_DIM, bn), lambda i: (0, i))],
            out_specs=pl.BlockSpec((MAPPING_SIZE, bn), lambda i: (0, i)),
        ),
        compiler_params=pltpu.CompilerParams(
            dimension_semantics=("parallel",)),
    )(x_t)

    # Back to the module's (N, mapping_size) layout; .squeeze() matches torch.
    return jnp.squeeze(out_t.T)


def _reference(x):
    x = jnp.asarray(x, jnp.float32)
    x_in = x if x.ndim > 1 else x[None, :]
    freq = np.tile(np.arange(UPPER_FREQ_INDEX), INPUT_DIM)    # [0..9, 0..9]
    scale = jnp.asarray(np.float32(np.pi) * (2.0 ** freq).astype(np.float32))
    xr = jnp.tile(x_in, (1, UPPER_FREQ_INDEX))                # [x0,x1]*10
    s = xr * scale
    return jnp.squeeze(jnp.concatenate([x_in, jnp.sin(s), jnp.cos(s)], axis=1))


if __name__ == "__main__":
    key = jax.random.PRNGKey(0)

    # 2-D case: (N, input_dim) UV-like coordinates.
    x2d = jax.random.uniform(key, (16, INPUT_DIM), jnp.float32,
                             minval=-1.0, maxval=1.0)
    out2d = jax.block_until_ready(position_encoding(x2d))
    ref2d = jax.block_until_ready(_reference(x2d))
    assert out2d.shape == (16, MAPPING_SIZE), out2d.shape
    np.testing.assert_allclose(np.asarray(out2d), np.asarray(ref2d),
                               rtol=1e-5, atol=1e-5)

    # 1-D case: single coordinate -> squeezed (mapping_size,) output.
    x1d = jax.random.uniform(jax.random.PRNGKey(1), (INPUT_DIM,), jnp.float32)
    out1d = jax.block_until_ready(position_encoding(x1d))
    ref1d = jax.block_until_ready(_reference(x1d))
    assert out1d.shape == (MAPPING_SIZE,), out1d.shape
    np.testing.assert_allclose(np.asarray(out1d), np.asarray(ref1d),
                               rtol=1e-5, atol=1e-5)

    # Multi-block + ragged last block (grid > 1 path), small tile for coverage.
    xrg = jax.random.uniform(jax.random.PRNGKey(2), (300, INPUT_DIM),
                             jnp.float32, minval=-1.0, maxval=1.0)
    outrg = jax.block_until_ready(position_encoding(xrg, tn=128))
    refrg = jax.block_until_ready(_reference(xrg))
    assert outrg.shape == (300, MAPPING_SIZE), outrg.shape
    np.testing.assert_allclose(np.asarray(outrg), np.asarray(refrg),
                               rtol=1e-5, atol=1e-5)

    print("KERNEL_OK")
</pallas_src>

<mosaic_0001>
module attributes {stable_mosaic.version = 11 : i64} {
  func.func @_pos_enc_kernel(%arg0: i32, %arg1: memref<2x16xf32, #tpu.memory_space<vmem>>, %arg2: memref<42x16xf32, #tpu.memory_space<vmem>>) attributes {dimension_semantics = [#tpu.dimension_semantics<parallel>], iteration_bounds = array<i64: 1>, scalar_prefetch = 0 : i64, scratch_operands = 0 : i64, tpu.core_type = #tpu.core_type<tc>, window_params = [{transform_indices = @transform_0, window_bounds = array<i64: 2, 16>}, {transform_indices = @transform_1, window_bounds = array<i64: 42, 16>}]} {
    %c0 = arith.constant 0 : index
    %c0_0 = arith.constant 0 : index
    %0 = vector.load %arg1[%c0, %c0_0] : memref<2x16xf32, #tpu.memory_space<vmem>>, vector<2x16xf32>
    %1 = tpu.iota {dimensions = array<i32: 0>} : vector<20x1xi32>
    %c10_i32 = arith.constant 10 : i32
    %c0_i32 = arith.constant 0 : i32
    %2 = arith.cmpi eq, %c10_i32, %c0_i32 : i32
    %c1_i32 = arith.constant 1 : i32
    %3 = arith.select %2, %c1_i32, %c10_i32 : i32
    %4 = vector.broadcast %3 : i32 to vector<20x1xi32>
    %5 = arith.remsi %1, %4 : vector<20x1xi32>
    %c0_i32_1 = arith.constant 0 : i32
    %6 = vector.broadcast %c0_i32_1 : i32 to vector<20x1xi32>
    %7 = arith.cmpi ne, %5, %6 : vector<20x1xi32>
    %c0_i32_2 = arith.constant 0 : i32
    %8 = vector.broadcast %c0_i32_2 : i32 to vector<20x1xi32>
    %9 = arith.cmpi slt, %5, %8 : vector<20x1xi32>
    %c0_i32_3 = arith.constant 0 : i32
    %10 = arith.cmpi slt, %3, %c0_i32_3 : i32
    %11 = vector.broadcast %10 : i1 to vector<20x1xi1>
    %12 = vector.broadcast %11 : vector<20x1xi1> to vector<20x1xi1>
    %13 = arith.xori %9, %12 : vector<20x1xi1>
    %14 = arith.andi %13, %7 : vector<20x1xi1>
    %15 = vector.broadcast %3 : i32 to vector<20x1xi32>
    %16 = arith.addi %5, %15 : vector<20x1xi32>
    %17 = arith.select %14, %16, %5 : vector<20x1xi1>, vector<20x1xi32>
    %c1_i32_4 = arith.constant 1 : i32
    %18 = vector.broadcast %c1_i32_4 : i32 to vector<20x1xi32>
    %19 = arith.shli %18, %17 : vector<20x1xi32>
    %20 = arith.sitofp %19 : vector<20x1xi32> to vector<20x1xf32>
    %cst = arith.constant 3.14159274 : f32
    %21 = vector.broadcast %cst : f32 to vector<20x1xf32>
    %22 = arith.mulf %21, %20 : vector<20x1xf32>
    %23 = vector.shape_cast %0 : vector<2x16xf32> to vector<1x2x16xf32>
    %24 = vector.shape_cast %23 : vector<1x2x16xf32> to vector<1x2x16xf32>
    %25 = vector.broadcast %24 : vector<1x2x16xf32> to vector<10x2x16xf32>
    %26 = vector.shape_cast %25 : vector<10x2x16xf32> to vector<20x16xf32>
    %27 = vector.broadcast %22 : vector<20x1xf32> to vector<20x16xf32>
    %28 = arith.mulf %26, %27 : vector<20x16xf32>
    %c0_5 = arith.constant 0 : index
    %c0_6 = arith.constant 0 : index
    %29 = vector.load %arg2[%c0_5, %c0_6] : memref<42x16xf32, #tpu.memory_space<vmem>>, vector<2x16xf32>
    tpu.vector_store %arg2[%c0_5, %c0_6], %0 {strides = array<i32>} : memref<42x16xf32, #tpu.memory_space<vmem>>, vector<2x16xf32>,
    %30 = math.sin %28 : vector<20x16xf32>
    %c2 = arith.constant 2 : index
    %c0_7 = arith.constant 0 : index
    %31 = vector.load %arg2[%c2, %c0_7] : memref<42x16xf32, #tpu.memory_space<vmem>>, vector<20x16xf32>
    tpu.vector_store %arg2[%c2, %c0_7], %30 {strides = array<i32>} : memref<42x16xf32, #tpu.memory_space<vmem>>, vector<20x16xf32>,
    %32 = math.cos %28 : vector<20x16xf32>
    %c22 = arith.constant 22 : index
    %c0_8 = arith.constant 0 : index
    %33 = vector.load %arg2[%c22, %c0_8] : memref<42x16xf32, #tpu.memory_space<vmem>>, vector<20x16xf32>
    tpu.vector_store %arg2[%c22, %c0_8], %32 {strides = array<i32>} : memref<42x16xf32, #tpu.memory_space<vmem>>, vector<20x16xf32>,
    return
  }
  func.func @transform_0(%arg0: i32) -> (i32, i32) {
    %c0_i32 = arith.constant 0 : i32
    %c0_i32_0 = arith.constant 0 : i32
    return %c0_i32, %arg0 : i32, i32
  }
  func.func @transform_1(%arg0: i32) -> (i32, i32) {
    %c0_i32 = arith.constant 0 : i32
    %c0_i32_0 = arith.constant 0 : i32
    return %c0_i32, %arg0 : i32, i32
  }
}

</mosaic_0001>

<bundles_post_ra>
// kernel: tpu_custom_call.1
= control target key start
LH: loop header
LB: loop body
LE: loop exit
PB: predicated region body
PF: predicated region fallthrough
CT: control target
= control target key end

     0   :  { %6 = vsyncpa [#allocation3], 0  ;;  %s2571_s6 = smov [#allocation2]   ;;  %s3842_s0 = inlined_call_operand.hbm [shape: f32[2,16], index: 0, kind: input, shape index: {}]   ;;  %s3843_s1 = inlined_call_operand.vmem [shape: f32[42,16], index: 1, kind: output, shape index: {}]  }
   0x1   :  { %s13_s7 = sshll.u32 %s2571_s6, 4  ;;  %s14_s7 = int_to_ptr.vmem [resolvable:$true] %s13_s7 }
   0x2   :  { %s2557_s8 = scalar_lea.vmem %s14_s7, 32  ;;  %p2562_p1 = scmp.lt.s32.totalorder %s14_s7, %s14_s7 }
   0x3   :  { %p2558_p0 = scmp.ne.s32.totalorder %s14_s7, %s2557_s8  ;;  %p2563_p2 = scmp.lt.s32.totalorder %s2557_s8, %s2557_s8 }
   0x5   :  { %p2564_p3 = por %p2563_p2, %p2562_p1 }
   0x7   :  { %p2565_p4 = pnand %p2564_p3, %p2558_p0 }
   0x9   :  { %2568 = shalt.err (!%p2565_p4)
}
   0xa   :  { %16 = dma.hbm_to_vmem [thread:$0]  %s3842_s0, 32, %s14_s7, [#allocation3]  }
   0xb   :  { %2569 = dma.done.wait [#allocation3], 32  }
   0xc   :  { %2570 = vsyncadd [#allocation3], 4294967264  ;;  %v21_v0 = vlaneseq  ;;  %vm175_vm0 = vcmask 123904   ;;  %v2607_v7 = vld [vmem:[#allocation2] sm:$0x3]  ;;  %v2575_v29 = vmov 1  }
   0xd   :  { %176 = vst.msk [vmem:[%s3843_s1] sm:$0x3] %vm175_vm0, %v2607_v7  ;;  %v2572_v13 = vmov 269488144   ;;  %v2573_v15 = vmov 842150450  }
   0xe   :  { %v2597_v1 = vshrl.u32 %v21_v0, 7  ;;  %v86_v14 = vunpack.c.l.s4 %v2572_v13  ;;  %v93_v16 = vunpack.c.l.s4 %v2573_v15  ;;  %v2574_v17 = vmov 1414812756  }
   0xf   :  { %v100_v18 = vunpack.c.l.s4 %v2574_v17  ;;  %v2576_v44 = vmov 1987475062  }
  0x10   :  { %v24_v2 = vadd.s32 16, %v2597_v1  ;;  %v2601_v3 = vmul.u32.u64.low 3435973837, %v2597_v1  ;;  %v2602_v4 = vmul.u32.u64.high 3435973837, %v2597_v1, %v2601_v3  ;;  %v23_v19 = vadd.s32 8, %v2597_v1 }
  0x11   :  { %v87_v22 = vunpack.c.0.s8 %v86_v14  ;;  %v94_v23 = vunpack.c.0.s8 %v93_v16  ;;  %v101_v26 = vunpack.c.0.s8 %v100_v18  ;;  %v107_v45 = vunpack.c.l.s4 %v2576_v44 }
  0x12   :  { %v2604_v5 = vmul.u32.u64.low 3435973837, %v24_v2  ;;  %v2605_v6 = vmul.u32.u64.high 3435973837, %v24_v2, %v2604_v5  ;;  %v31_v8 = vshrl.u32 %v2602_v4, 3 }
  0x13   :  { %v2617_v27 = vmul.u32.u64.low 3435973837, %v23_v19  ;;  %v2618_v28 = vmul.u32.u64.high 3435973837, %v23_v19, %v2617_v27  ;;  %v2623_v34 = vsub.s32 %v87_v22, %v2597_v1  ;;  %v2626_v35 = vsub.s32 %v94_v23, %v2597_v1 }
  0x14   :  { %v32_v9 = vmul.u32 10, %v31_v8  ;;  %v53_v10 = vshrl.u32 %v2605_v6, 3  ;;  %v2629_v36 = vsub.s32 %v101_v26, %v2597_v1  ;;  %v108_v56 = vunpack.c.0.s8 %v107_v45 }
  0x15   :  { %v42_v43 = vshrl.u32 %v2618_v28, 3  ;;  %v3856_v26 = vmov 2475754826   ;;  %v3858_v28 = vmov 2131351028  }
  0x16   :  { %v33_v11 = vsub.s32 %v2597_v1, %v32_v9  ;;  %v54_v12 = vmul.u32 10, %v53_v10  ;;  %v2669_v3 = vsub.s32 %v108_v56, %v2597_v1  ;;  %v3862_v45 = vmov 1326507024  }
  0x17   :  { %v43_v55 = vmul.u32 10, %v42_v43 }
  0x18   :  { %v55_v20 = vsub.s32 %v24_v2, %v54_v12  ;;  %vm58_vm1 = vcmp.ne.s32.totalorder %v33_v11, 0  ;;  %vm61_vm2 = vcmp.lt.s32.totalorder %v33_v11, 0  ;;  %v67_v21 = vadd.s32 10, %v33_v11 }
  0x19   :  { %vm64_vm3 = vmand %vm61_vm2, %vm58_vm1  ;;  %v2666_v2 = vsub.s32 %v23_v19, %v43_v55 }
  0x1a   :  { %vm60_vm4 = vcmp.ne.s32.totalorder %v55_v20, 0  ;;  %vm63_vm5 = vcmp.lt.s32.totalorder %v55_v20, 0  ;;  %v69_v24 = vadd.s32 10, %v55_v20  ;;  %v70_v25 = vsel %vm64_vm3, %v67_v21, %v33_v11 }
  0x1b   :  { %vm66_vm6 = vmand %vm63_vm5, %vm60_vm4  ;;  %v73_v30 = vshll.u32 %v2575_v29, %v70_v25  ;;  %v2672_v12 = vadd.s32 10, %v2666_v2  ;;  %vm59_vm13 = vcmp.ne.s32.totalorder %v2666_v2, 0  ;;  %vm62_vm14 = vcmp.lt.s32.totalorder %v2666_v2, 0 }
  0x1c   :  { %v72_v31 = vsel %vm66_vm6, %v69_v24, %v55_v20  ;;  %v3860_v24 = vmov 683565275   ;;  %vm2745_vm5 = vmand %vm62_vm14, %vm59_vm13 }
  0x1d   :  { %v75_v32 = vshll.u32 %v2575_v29, %v72_v31  ;;  %v76_v33 = vcvt.s32.f32 %v73_v30  ;;  %v3850_v31 = vmov 2102212464  }
  0x1f   :  { %v78_v37 = vcvt.s32.f32 %v75_v32  ;;  %v2631_v38 = vmul.f32 3.1415927, %v76_v33  ;;  %v3879_v33 = vmov 920167782  }
  0x21   :  { %v81_v39 = vmul.f32 3.1415927, %v78_v37  ;;  %v91_v40 = vrot.slane %v2631_v38, %v2623_v34  ;;  %v98_v41 = vrot.slane %v2631_v38, %v2626_v35  ;;  %v105_v42 = vrot.slane %v2631_v38, %v2629_v36 }
  0x22   :  { %v112_v13 = vrot.slane %v2631_v38, %v2669_v3 }
  0x23   :  { %v147_v46 = vrot.slane %v81_v39, %v2623_v34  ;;  %v154_v47 = vrot.slane %v81_v39, %v2626_v35  ;;  %v2643_v48 = vmul.f32 %v91_v40, %v2607_v7  ;;  %v2646_v49 = vmul.f32 %v98_v41, %v2607_v7 }
  0x24   :  { %v2649_v50 = vmul.f32 %v105_v42, %v2607_v7 }
  0x25   :  { %3892 = vst [vmem:[#allocation5_spill] sm:$0xff] %v2646_v49  ;;  %v2652_v51 = vmul.f32 %v147_v46, %v2607_v7  ;;  %v2655_v52 = vmul.f32 %v154_v47, %v2607_v7  ;;  %v177_v53 = vand.u32 2147483647, %v2643_v48  ;;  %v180_v54 = vand.u32 2139095040, %v2643_v48 }
  0x26   :  { %3893 = vst [vmem:[#allocation6_spill] sm:$0xff] %v2649_v50  ;;  %v281_v57 = vand.u32 2147483647, %v2646_v49  ;;  %v284_v58 = vand.u32 2139095040, %v2646_v49  ;;  %v388_v63 = vand.u32 2139095040, %v2649_v50  ;;  %vm179_vm13 = vcmp.lt.s32.totalorder %v2643_v48, 0 }
  0x27   :  { %3894 = vst [vmem:[#allocation7_spill] sm:$0xff] %v2655_v52  ;;  %v181_v59 = vshrl.u32 %v180_v54, 23  ;;  %v184_v60 = vand.u32 8388607, %v177_v53  ;;  %v385_v18 = vand.u32 2147483647, %v2649_v50 }
  0x28   :  { %v285_v61 = vshrl.u32 %v284_v58, 23  ;;  %v288_v62 = vand.u32 8388607, %v281_v57  ;;  %v389_v5 = vshrl.u32 %v388_v63, 23 }
  0x29   :  { %v2370_v0 = vadd.s32 4294967169, %v181_v59  ;;  %v185_v8 = vor.u32 8388608, %v184_v60 }
  0x2a   :  { %v2374_v4 = vadd.s32 4294967169, %v285_v61  ;;  %v289_v9 = vor.u32 8388608, %v288_v62  ;;  %v2378_v11 = vadd.s32 4294967169, %v389_v5 }
  0x2b   :  { %v187_v6 = vadd.s32 1, %v2370_v0  ;;  %v2677_v19 = vshll.u32 %v185_v8, 8 }
  0x2c   :  { %v291_v10 = vadd.s32 1, %v2374_v4  ;;  %v2679_v21 = vshll.u32 %v289_v9, 8  ;;  %v2681_v22 = vadd.s32 1, %v2378_v11 }
  0x2d   :  { %vm188_vm7 = vcmp.gt.s32.totalorder %v187_v6, 0 }
  0x2e   :  { %v189_v14 = vsel %vm188_vm7, %v187_v6, 0  ;;  %vm292_vm8 = vcmp.gt.s32.totalorder %v291_v10, 0  ;;  %vm396_vm15 = vcmp.gt.s32.totalorder %v2681_v22, 0 }
  0x2f   :  { %v190_v15 = vshrl.u32 %v189_v14, 5  ;;  %v191_v16 = vand.u32 31, %v189_v14  ;;  %v293_v17 = vsel %vm292_vm8, %v291_v10, 0 }
  0x30   :  { %v295_v20 = vand.u32 31, %v293_v17  ;;  %v2688_v39 = vshrl.u32 %v293_v17, 5 }
  0x31   :  { %v192_v23 = vsub.s32 32, %v191_v16  ;;  %v194_v25 = vshll.u32 %v3860_v24, %v191_v16  ;;  %v197_v27 = vshll.u32 %v3856_v26, %v191_v16  ;;  %v200_v30 = vshll.u32 %v3858_v28, %v191_v16 }
  0x32   :  { %v203_v32 = vshll.u32 %v3850_v31, %v191_v16  ;;  %v206_v37 = vshll.u32 %v3879_v33, %v191_v16  ;;  %vm209_vm9 = vcmp.lt.s32.totalorder %v190_v15, 1  ;;  %vm210_vm10 = vcmp.lt.s32.totalorder %v190_v15, 2 }
  0x33   :  { %v193_v40 = vshrl.u32 %v3860_v24, %v192_v23  ;;  %v195_v41 = vshrl.u32 %v3856_v26, %v192_v23  ;;  %v198_v42 = vshrl.u32 %v3858_v28, %v192_v23  ;;  %v201_v43 = vshrl.u32 %v3850_v31, %v192_v23 }
  0x34   :  { %v204_v44 = vshrl.u32 %v3879_v33, %v192_v23  ;;  %v207_v46 = vshrl.u32 %v3862_v45, %v192_v23  ;;  %vm212_vm11 = vcmp.lt.s32.totalorder %v190_v15, 4  ;;  %v296_v56 = vsub.s32 32, %v295_v20 }
  0x35   :  { %v196_v47 = vor.u32 %v195_v41, %v194_v25  ;;  %v199_v54 = vor.u32 %v198_v42, %v197_v27  ;;  %v202_v55 = vor.u32 %v201_v43, %v200_v30  ;;  %vm211_vm12 = vcmp.lt.s32.totalorder %v190_v15, 3 }
  0x36   :  { %v205_v58 = vor.u32 %v204_v44, %v203_v32  ;;  %v208_v59 = vor.u32 %v207_v46, %v206_v37  ;;  %v298_v60 = vshll.u32 %v3860_v24, %v295_v20  ;;  %v301_v8 = vshll.u32 %v3856_v26, %v295_v20 }
  0x37   :  { %v213_v61 = vsel %vm209_vm9, %v193_v40, %v196_v47  ;;  %v214_v62 = vsel %vm212_vm11, %v202_v55, 2102212464  ;;  %v217_v63 = vsel %vm209_vm9, %v196_v47, %v199_v54  ;;  %v221_v0 = vsel %vm209_vm9, %v199_v54, %v202_v55 }
  0x38   :  { %v215_v4 = vsel %vm211_vm12, %v199_v54, %v214_v62  ;;  %v218_v5 = vsel %vm212_vm11, %v205_v58, 920167782  ;;  %v222_v6 = vsel %vm212_vm11, %v208_v59, 1326507024  ;;  %v297_v11 = vshrl.u32 %v3860_v24, %v296_v56 }
  0x39   :  { %v219_v9 = vsel %vm211_vm12, %v202_v55, %v218_v5  ;;  %v223_v10 = vsel %vm211_vm12, %v205_v58, %v222_v6  ;;  %v299_v14 = vshrl.u32 %v3856_v26, %v296_v56  ;;  %v216_v16 = vsel %vm210_vm10, %v213_v61, %v215_v4 }
  0x3a   :  { %v220_v17 = vsel %vm210_vm10, %v217_v63, %v219_v9  ;;  %v224_v23 = vsel %vm210_vm10, %v221_v0, %v223_v10  ;;  %v302_v25 = vshrl.u32 %v3858_v28, %v296_v56  ;;  %v304_v42 = vshll.u32 %v3858_v28, %v295_v20 }
  0x3b   :  { %v2714_v27 = vmul.u32.u64.low %v2677_v19, %v224_v23  ;;  %v2715_v30 = vmul.u32.u64.high %v2677_v19, %v224_v23, %v2714_v27  ;;  %v2718_v32 = vmul.u32.u64.low %v2677_v19, %v220_v17  ;;  %v2719_v37 = vmul.u32.u64.high %v2677_v19, %v220_v17, %v2718_v32 }
  0x3c   :  { %v300_v40 = vor.u32 %v299_v14, %v298_v60  ;;  %v303_v41 = vor.u32 %v302_v25, %v301_v8  ;;  %v305_v43 = vshrl.u32 %v3850_v31, %v296_v56  ;;  %v307_v15 = vshll.u32 %v3850_v31, %v295_v20 }
  0x3d   :  { %v308_v44 = vshrl.u32 %v3879_v33, %v296_v56  ;;  %v310_v46 = vshll.u32 %v3879_v33, %v295_v20  ;;  %v311_v47 = vshrl.u32 %v3862_v45, %v296_v56  ;;  %v232_v54 = vmul.u32 %v2677_v19, %v216_v16 }
  0x3e   :  { %v306_v55 = vor.u32 %v305_v43, %v304_v42  ;;  %vm313_vm0 = vcmp.lt.s32.totalorder %v2688_v39, 1  ;;  %vm314_vm1 = vcmp.lt.s32.totalorder %v2688_v39, 2  ;;  %vm234_vm2 = vc.u32 %v2715_v30, %v2718_v32 }
  0x3f   :  { %v235_v58 = vadd.s32 1, %v2719_v37  ;;  %v309_v59 = vor.u32 %v308_v44, %v307_v15  ;;  %vm315_vm3 = vcmp.lt.s32.totalorder %v2688_v39, 3  ;;  %v312_v60 = vor.u32 %v311_v47, %v310_v46 }
  0x40   :  { %vm316_vm4 = vcmp.lt.s32.totalorder %v2688_v39, 4  ;;  %v317_v20 = vsel %vm313_vm0, %v297_v11, %v300_v40  ;;  %v321_v56 = vsel %vm313_vm0, %v300_v40, %v303_v41  ;;  %v325_v63 = vsel %vm313_vm0, %v303_v41, %v306_v55 }
  0x41   :  { %v236_v19 = vsel %vm234_vm2, %v235_v58, %v2719_v37  ;;  %v318_v61 = vsel %vm316_vm4, %v306_v55, 2102212464  ;;  %v322_v62 = vsel %vm316_vm4, %v309_v59, 920167782  ;;  %v326_v6 = vsel %vm316_vm4, %v312_v60, 1326507024 }
  0x42   :  { %v237_v0 = vadd.s32 %v236_v19, %v232_v54  ;;  %v319_v4 = vsel %vm315_vm3, %v303_v41, %v318_v61  ;;  %v323_v5 = vsel %vm315_vm3, %v306_v55, %v322_v62  ;;  %v327_v11 = vsel %vm315_vm3, %v309_v59, %v326_v6 }
  0x43   :  { %v320_v9 = vsel %vm314_vm1, %v317_v20, %v319_v4  ;;  %v324_v10 = vsel %vm314_vm1, %v321_v56, %v323_v5  ;;  %v397_v14 = vsel %vm396_vm15, %v2681_v22, 0  ;;  %v328_v17 = vsel %vm314_vm1, %v325_v63, %v327_v11 }
  0x44   :  { %v238_v16 = vadd.s32 536870912, %v237_v0  ;;  %v2761_v23 = vmul.u32.u64.low %v2679_v21, %v324_v10  ;;  %v2762_v25 = vmul.u32.u64.high %v2679_v21, %v324_v10, %v2761_v23  ;;  %v392_v40 = vand.u32 8388607, %v385_v18 }
  0x45   :  { %v2766_v27 = vmul.u32.u64.low %v2679_v21, %v328_v17  ;;  %v2767_v37 = vmul.u32.u64.high %v2679_v21, %v328_v17, %v2766_v27  ;;  %v71_v22 = vsel %vm2745_vm5, %v2672_v12, %v2666_v2  ;;  %v2779_v39 = vmul.f32 %v112_v13, %v2607_v7 }
  0x46   :  { %v2781_v41 = vshrl.u32 %v238_v16, 30  ;;  %v399_v42 = vand.u32 31, %v397_v14  ;;  %v336_v43 = vmul.u32 %v2679_v21, %v320_v9  ;;  %v339_v44 = vadd.s32 1, %v2762_v25 }
  0x47   :  { %v74_v47 = vshll.u32 %v2575_v29, %v71_v22  ;;  %vm338_vm6 = vc.u32 %v2767_v37, %v2761_v23  ;;  %v393_v2 = vor.u32 8388608, %v392_v40  ;;  %v398_v13 = vshrl.u32 %v397_v14, 5 }
  0x48   :  { %v240_v15 = vshll.u32 %v2781_v41, 30  ;;  %v400_v46 = vsub.s32 32, %v399_v42  ;;  %v340_v38 = vsel %vm338_vm6, %v339_v44, %v2762_v25  ;;  %v492_v54 = vand.u32 2139095040, %v2779_v39 }
  0x49   :  { %v341_v55 = vadd.s32 %v340_v38, %v336_v43  ;;  %v402_v21 = vshll.u32 %v3860_v24, %v399_v42  ;;  %v405_v59 = vshll.u32 %v3856_v26, %v399_v42  ;;  %v408_v20 = vshll.u32 %v3858_v28, %v399_v42 }
  0x4a   :  { %v2789_v12 = vsub.s32 %v237_v0, %v240_v15  ;;  %v403_v58 = vshrl.u32 %v3856_v26, %v400_v46  ;;  %v406_v60 = vshrl.u32 %v3858_v28, %v400_v46  ;;  %v409_v56 = vshrl.u32 %v3850_v31, %v400_v46 }
  0x4b   :  { %v77_v19 = vcvt.s32.f32 %v74_v47  ;;  %v342_v61 = vadd.s32 536870912, %v341_v55  ;;  %v411_v62 = vshll.u32 %v3850_v31, %v399_v42  ;;  %v2801_v63 = vshll.u32 %v393_v2, 8 }
  0x4c   :  { %v243_v29 = vsub.s32 0, %v2789_v12  ;;  %v412_v4 = vshrl.u32 %v3879_v33, %v400_v46  ;;  %vm420_vm7 = vcmp.lt.s32.totalorder %v398_v13, 4  ;;  %v493_v5 = vshrl.u32 %v492_v54, 23 }
  0x4d   :  { %v2805_v6 = vshrl.u32 %v342_v61, 30  ;;  %v401_v8 = vshrl.u32 %v3860_v24, %v400_v46  ;;  %v414_v9 = vshll.u32 %v3879_v33, %v399_v42  ;;  %v415_v10 = vshrl.u32 %v3862_v45, %v400_v46 }
  0x4e   :  { %v2371_v0 = vmin.u32 %v243_v29, %v2789_v12  ;;  %v404_v14 = vor.u32 %v403_v58, %v402_v21  ;;  %v407_v16 = vor.u32 %v406_v60, %v405_v59  ;;  %v410_v17 = vor.u32 %v409_v56, %v408_v20 }
  0x4f   :  { %v344_v25 = vshll.u32 %v2805_v6, 30  ;;  %v413_v27 = vor.u32 %v412_v4, %v411_v62  ;;  %vm417_vm8 = vcmp.lt.s32.totalorder %v398_v13, 1  ;;  %vm419_vm9 = vcmp.lt.s32.totalorder %v398_v13, 3 }
  0x50   :  { %v245_v11 = vclz %v2371_v0  ;;  %v233_v40 = vadd.s32 %v2718_v32, %v2715_v30  ;;  %v416_v43 = vor.u32 %v415_v10, %v414_v9  ;;  %v422_v15 = vsel %vm420_vm7, %v410_v17, 2102212464 }
  0x51   :  { %v2814_v44 = vsub.s32 %v341_v55, %v344_v25  ;;  %vm418_vm10 = vcmp.lt.s32.totalorder %v398_v13, 2  ;;  %v426_v42 = vsel %vm420_vm7, %v413_v27, 920167782  ;;  %v2382_v46 = vadd.s32 4294967169, %v493_v5 }
  0x52   :  { %v2372_v22 = vadd.s32 4294967294, %v245_v11  ;;  %v421_v47 = vsel %vm417_vm8, %v401_v8, %v404_v14  ;;  %v425_v2 = vsel %vm417_vm8, %v404_v14, %v407_v16  ;;  %v427_v38 = vsel %vm419_vm9, %v410_v17, %v426_v42 }
  0x53   :  { %v347_v30 = vsub.s32 0, %v2814_v44  ;;  %v423_v32 = vsel %vm419_vm9, %v407_v16, %v422_v15  ;;  %v429_v21 = vsel %vm417_vm8, %v407_v16, %v410_v17  ;;  %v430_v29 = vsel %vm420_vm7, %v416_v43, 1326507024 }
  0x54   :  { %vm2373_vm11 = vcmp.lt.s32.totalorder %v2372_v22, 0  ;;  %v2825_v60 = vmul.f32 3.1415927, %v77_v19  ;;  %v428_v56 = vsel %vm418_vm10, %v425_v2, %v427_v38  ;;  %v431_v61 = vsel %vm419_vm9, %v413_v27, %v430_v29 }
  0x55   :  { %v248_v54 = vsel %vm2373_vm11, 0, %v2372_v22  ;;  %v2375_v20 = vmin.u32 %v347_v30, %v2814_v44  ;;  %v432_v4 = vsel %vm418_vm10, %v429_v21, %v431_v61  ;;  %v499_v5 = vadd.s32 1, %v2382_v46 }
  0x56   :  { %v249_v55 = vsub.s32 32, %v248_v54  ;;  %v250_v58 = vshll.u32 %v2789_v12, %v248_v54  ;;  %v253_v59 = vsub.s32 4294967266, %v248_v54  ;;  %v263_v8 = vsub.s32 4, %v2781_v41 }
  0x57   :  { %v349_v9 = vclz %v2375_v20  ;;  %v424_v12 = vsel %vm418_vm10, %v421_v47, %v423_v32  ;;  %v489_v10 = vand.u32 2147483647, %v2779_v39  ;;  %vm500_vm12 = vcmp.gt.s32.totalorder %v499_v5, 0 }
  0x58   :  { %v251_v62 = vshrl.u32 %v233_v40, %v249_v55  ;;  %v254_v0 = vadd.s32 127, %v253_v59  ;;  %v2835_v14 = vmul.u32.u64.low %v2801_v63, %v432_v4  ;;  %v2836_v16 = vmul.u32.u64.high %v2801_v63, %v432_v4, %v2835_v14 }
  0x59   :  { %v2376_v17 = vadd.s32 4294967294, %v349_v9  ;;  %v2839_v25 = vmul.u32.u64.low %v2801_v63, %v428_v56  ;;  %v2840_v27 = vmul.u32.u64.high %v2801_v63, %v428_v56, %v2839_v25  ;;  %v501_v22 = vsel %vm500_vm12, %v499_v5, 0 }
  0x5a   :  { %v252_v19 = vor.u32 %v251_v62, %v250_v58  ;;  %v255_v11 = vshll.u32 %v254_v0, 23  ;;  %v264_v43 = vsel %vm179_vm13, %v263_v8, %v2781_v41  ;;  %v496_v15 = vand.u32 8388607, %v489_v10 }
  0x5b   :  { %vm2377_vm14 = vcmp.lt.s32.totalorder %v2376_v17, 0  ;;  %v503_v42 = vand.u32 31, %v501_v22  ;;  %v440_v2 = vmul.u32 %v2801_v63, %v424_v12  ;;  %vm442_vm15 = vc.u32 %v2836_v16, %v2839_v25 }
  0x5c   :  { %v256_v40 = vor.u32 4788187, %v255_v11  ;;  %v259_v13 = vcvt.s32.f32 %v252_v19  ;;  %v352_v47 = vsel %vm2377_vm14, 0, %v2376_v17  ;;  %v119_v38 = vrot.slane %v2825_v60, %v2623_v34 }
  0x5d   :  { %vm2856_vm0 = vcmp.le.f32.partialorder %v177_v53, 0.7853982  ;;  %v357_v41 = vsub.s32 4294967266, %v352_v47  ;;  %v443_v30 = vadd.s32 1, %v2840_v27  ;;  %v337_v21 = vadd.s32 %v2761_v23, %v2767_v37 }
  0x5e   :  { %v257_v46 = vand.u32 2147483647, %v256_v40  ;;  %v353_v63 = vsub.s32 32, %v352_v47  ;;  %v504_v55 = vsub.s32 32, %v503_v42  ;;  %v2865_v58 = vsel %vm2856_vm0, 0, %v264_v43 }
  0x5f   :  { %v358_v34 = vadd.s32 127, %v357_v41  ;;  %v444_v59 = vsel %vm442_vm15, %v443_v30, %v2840_v27  ;;  %v497_v53 = vor.u32 8388608, %v496_v15  ;;  %v506_v56 = vshll.u32 %v3860_v24, %v503_v42 }
  0x60   :  { %v260_v32 = vmul.f32 %v259_v13, %v257_v46  ;;  %v445_v20 = vadd.s32 %v444_v59, %v440_v2  ;;  %v507_v61 = vshrl.u32 %v3856_v26, %v504_v55  ;;  %v354_v62 = vshll.u32 %v2814_v44, %v352_v47 }
  0x61   :  { %v2871_v0 = vshrl.u32 %v501_v22, 5  ;;  %v509_v23 = vshll.u32 %v3856_v26, %v503_v42  ;;  %v510_v37 = vshrl.u32 %v3858_v28, %v504_v55  ;;  %v355_v5 = vshrl.u32 %v337_v21, %v353_v63 }
  0x62   :  { %v261_v29 = vxor.u32 2147483648, %v260_v32  ;;  %v446_v8 = vadd.s32 536870912, %v445_v20  ;;  %v515_v9 = vshll.u32 %v3850_v31, %v503_v42  ;;  %v359_v19 = vshll.u32 %v358_v34, 23 }
  0x63   :  { %v512_v44 = vshll.u32 %v3858_v28, %v503_v42  ;;  %v513_v11 = vshrl.u32 %v3850_v31, %v504_v55  ;;  %v508_v17 = vor.u32 %v507_v61, %v506_v56  ;;  %v516_v27 = vshrl.u32 %v3879_v33, %v504_v55 }
  0x64   :  { %v262_v4 = vsel %vm179_vm13, %v261_v29, %v260_v32  ;;  %v2883_v14 = vshrl.u32 %v446_v8, 30  ;;  %v511_v40 = vor.u32 %v510_v37, %v509_v23  ;;  %v518_v13 = vshll.u32 %v3879_v33, %v503_v42 }
  0x65   :  { %v265_v12 = vsel %vm2856_vm0, %v2643_v48, %v262_v4  ;;  %v519_v22 = vshrl.u32 %v3862_v45, %v504_v55  ;;  %v270_v43 = vadd.s32 3, %v2865_v58  ;;  %v517_v46 = vor.u32 %v516_v27, %v515_v9 }
  0x66   :  { %2509 = vcosq.f32 %v265_v12  ;;  %v448_v15 = vshll.u32 %v2883_v14, 30  ;;  %vm521_vm1 = vcmp.lt.s32.totalorder %v2871_v0, 1  ;;  %v356_v47 = vor.u32 %v355_v5, %v354_v62 }
  0x67   :  { %2511 = vsinq.f32 %v265_v12  ;;  %v360_v2 = vor.u32 4788187, %v359_v19  ;;  %v514_v54 = vor.u32 %v513_v11, %v512_v44  ;;  %v2891_v41 = vshll.u32 %v497_v53, 8 }
  0x68   :  { %v2893_v30 = vsub.s32 %v445_v20, %v448_v15  ;;  %v505_v32 = vshrl.u32 %v3860_v24, %v504_v55  ;;  %vm523_vm2 = vcmp.lt.s32.totalorder %v2871_v0, 3  ;;  %vm524_vm3 = vcmp.lt.s32.totalorder %v2871_v0, 4 }
  0x69   :  { %v520_v42 = vor.u32 %v519_v22, %v518_v13  ;;  %vm522_vm4 = vcmp.lt.s32.totalorder %v2871_v0, 2  ;;  %v526_v21 = vsel %vm524_vm3, %v514_v54, 2102212464  ;;  %v529_v63 = vsel %vm521_vm1, %v508_v17, %v511_v40 }
  0x6a   :  { %v2904_v34 = vmul.f32 %v119_v38, %v2607_v7  ;;  %v271_v59 = vand.u32 3, %v270_v43  ;;  %v451_v53 = vsub.s32 0, %v2893_v30  ;;  %v530_v55 = vsel %vm524_vm3, %v517_v46, 920167782 }
  0x6b   :  { %v361_v29 = vand.u32 2147483647, %v360_v2  ;;  %v363_v20 = vcvt.s32.f32 %v356_v47  ;;  %v367_v56 = vsub.s32 4, %v2805_v6  ;;  %v531_v61 = vsel %vm523_vm2, %v514_v54, %v530_v55 }
  0x6c   :  { %v2379_v62 = vmin.u32 %v451_v53, %v2893_v30  ;;  %v525_v23 = vsel %vm521_vm1, %v505_v32, %v508_v17  ;;  %v527_v38 = vsel %vm523_vm2, %v511_v40, %v526_v21  ;;  %v532_v37 = vsel %vm522_vm4, %v529_v63, %v531_v61 }
  0x6d   :  { %v533_v4 = vsel %vm521_vm1, %v511_v40, %v514_v54  ;;  %v534_v5 = vsel %vm524_vm3, %v520_v42, 1326507024  ;;  %v2924_v8 = vmul.u32.u64.low %v2891_v41, %v532_v37  ;;  %v2925_v9 = vmul.u32.u64.high %v2891_v41, %v532_v37, %v2924_v8 }
  0x6e   :  { %vm269_vm5 = vweird.f32 %v2643_v48  ;;  %vm2931_vm6 = vcmp.le.f32.partialorder %v281_v57, 0.7853982  ;;  %vm283_vm7 = vcmp.lt.s32.totalorder %v2646_v49, 0  ;;  %v453_v19 = vclz %v2379_v62 }
  0x6f   :  { %vm272_vm8 = vcmp.lt.s32.totalorder %v271_v59, 2  ;;  %vm273_vm9 = vcmp.eq.s32.totalorder %v271_v59, 0  ;;  %vm276_vm10 = vcmp.eq.s32.totalorder %v271_v59, 2  ;;  %v535_v44 = vsel %vm523_vm2, %v517_v46, %v534_v5 }
  0x70   :  { %v2380_v11 = vadd.s32 4294967294, %v453_v19  ;;  %v528_v17 = vsel %vm522_vm4, %v525_v23, %v527_v38  ;;  %v536_v27 = vsel %vm522_vm4, %v533_v4, %v535_v44  ;;  %v596_v57 = vand.u32 2139095040, %v2904_v34 }
  0x71   :  { %v364_v13 = vmul.f32 %v363_v20, %v361_v29  ;;  %v368_v22 = vsel %vm283_vm7, %v367_v56, %v2805_v6  ;;  %v2949_v43 = vmul.u32.u64.low %v2891_v41, %v536_v27  ;;  %v2950_v15 = vmul.u32.u64.high %v2891_v41, %v536_v27, %v2949_v43 }
  0x72   :  { %vm2381_vm11 = vcmp.lt.s32.totalorder %v2380_v11, 0  ;;  %v547_v0 = vadd.s32 1, %v2925_v9  ;;  %v597_v2 = vshrl.u32 %v596_v57, 23  ;;  %v441_v32 = vadd.s32 %v2839_v25, %v2836_v16 }
  0x73   :  { %v2943_v40 = vpop.eup %2509  ;;  %v456_v42 = vsel %vm2381_vm11, 0, %v2380_v11  ;;  %v544_v6 = vmul.u32 %v2891_v41, %v528_v17  ;;  %v2966_v63 = vsel %vm2931_vm6, 0, %v368_v22  ;;  %v365_v16 = vxor.u32 2147483648, %v364_v13 }
  0x74   :  { %v2952_v46 = vpop.eup %2511  ;;  %v3844_v47 = vxor.u32 2147483648, %v2943_v40  ;;  %v457_v53 = vsub.s32 32, %v456_v42  ;;  %v461_v55 = vsub.s32 4294967266, %v456_v42  ;;  %vm546_vm12 = vc.u32 %v2950_v15, %v2924_v8 }
  0x75   :  { %v3849_v54 = vxor.u32 2147483648, %v2952_v46  ;;  %v2386_v25 = vadd.s32 4294967169, %v597_v2  ;;  %v458_v20 = vshll.u32 %v2893_v30, %v456_v42  ;;  %v548_v61 = vsel %vm546_vm12, %v547_v0, %v2925_v9 }
  0x76   :  { %v278_v21 = vsel %vm276_vm10, %v3844_v47, %v2952_v46  ;;  %v462_v56 = vadd.s32 127, %v461_v55  ;;  %v459_v23 = vshrl.u32 %v441_v32, %v457_v53  ;;  %v549_v38 = vadd.s32 %v548_v61, %v544_v6 }
  0x77   :  { %v275_v29 = vsel %vm273_vm9, %v2943_v40, %v3849_v54  ;;  %v603_v37 = vadd.s32 1, %v2386_v25  ;;  %v126_v4 = vrot.slane %v2825_v60, %v2626_v35  ;;  %v593_v59 = vand.u32 2147483647, %v2904_v34 }
  0x78   :  { %v279_v41 = vsel %vm272_vm8, %v275_v29, %v278_v21  ;;  %v463_v5 = vshll.u32 %v462_v56, 23  ;;  %v550_v19 = vadd.s32 536870912, %v549_v38  ;;  %v366_v30 = vsel %vm283_vm7, %v365_v16, %v364_v13 }
  0x79   :  { %v2979_v62 = vsel %vm269_vm5, nan, %v279_v41  ;;  %vm604_vm13 = vcmp.gt.s32.totalorder %v603_v37, 0  ;;  %v374_v9 = vadd.s32 3, %v2966_v63  ;;  %v460_v11 = vor.u32 %v459_v23, %v458_v20 }
  0x7a   :  { %v605_v44 = vsel %vm604_vm13, %v603_v37, 0  ;;  %v464_v17 = vor.u32 4788187, %v463_v5  ;;  %v2987_v27 = vshrl.u32 %v550_v19, 30  ;;  %v2990_v22 = vmul.f32 %v126_v4, %v2607_v7 }
  0x7b   :  { %v607_v57 = vand.u32 31, %v605_v44  ;;  %v369_v35 = vsel %vm2931_vm6, %v2646_v49, %v366_v30  ;;  %v600_v13 = vand.u32 8388607, %v593_v59  ;;  %v133_v2 = vrot.slane %v2825_v60, %v2629_v36 }
  0x7c   :  { %3901 = vst [vmem:[#allocation8_spill] sm:$0xff] %v2990_v22  ;;  %v552_v43 = vshll.u32 %v2987_v27, 30  ;;  %v140_v32 = vrot.slane %v2825_v60, %v2669_v3  ;;  %v3002_v42 = vand.u32 3, %v374_v9  ;;  %vm387_vm14 = vcmp.lt.s32.totalorder %v2649_v50, 0 }
  0x7d   :  { %v608_v0 = vsub.s32 32, %v607_v57  ;;  %v465_v6 = vand.u32 2147483647, %v464_v17  ;;  %v467_v21 = vcvt.s32.f32 %v460_v11  ;;  %v471_v12 = vsub.s32 4, %v2883_v14 }
  0x7e   :  { %v3006_v53 = vsub.s32 %v549_v38, %v552_v43  ;;  %2513 = vcosq.f32 %v369_v35  ;;  %v610_v55 = vshll.u32 %v3860_v24, %v607_v57  ;;  %v613_v16 = vshll.u32 %v3856_v26, %v607_v57 }
  0x7f   :  { %v611_v29 = vshrl.u32 %v3856_v26, %v608_v0  ;;  %v601_v41 = vor.u32 8388608, %v600_v13  ;;  %v614_v20 = vshrl.u32 %v3858_v28, %v608_v0  ;;  %v700_v56 = vand.u32 2139095040, %v2990_v22 }
  0x80   :  { %v555_v25 = vsub.s32 0, %v3006_v53  ;;  %vm3016_vm15 = vcmp.le.f32.partialorder %v385_v18, 0.7853982  ;;  %v606_v23 = vshrl.u32 %v605_v44, 5  ;;  %v616_v38 = vshll.u32 %v3858_v28, %v607_v57 }
  0x81   :  { %v617_v37 = vshrl.u32 %v3850_v31, %v608_v0  ;;  %v619_v4 = vshll.u32 %v3850_v31, %v607_v57  ;;  %2515 = vsinq.f32 %v369_v35  ;;  %v468_v5 = vmul.f32 %v467_v21, %v465_v6 }
  0x82   :  { %v472_v19 = vsel %vm387_vm14, %v471_v12, %v2883_v14  ;;  %v2383_v30 = vmin.u32 %v555_v25, %v3006_v53  ;;  %v612_v9 = vor.u32 %v611_v29, %v610_v55  ;;  %v615_v18 = vor.u32 %v614_v20, %v613_v16 }
  0x83   :  { %v620_v11 = vshrl.u32 %v3879_v33, %v608_v0  ;;  %v622_v44 = vshll.u32 %v3879_v33, %v607_v57  ;;  %v609_v43 = vshrl.u32 %v3860_v24, %v608_v0  ;;  %v3030_v13 = vshll.u32 %v601_v41, 8 }
  0x84   :  { %v557_v17 = vclz %v2383_v30  ;;  %v701_v47 = vshrl.u32 %v700_v56, 23  ;;  %v618_v35 = vor.u32 %v617_v37, %v616_v38  ;;  %v623_v21 = vshrl.u32 %v3862_v45, %v608_v0 }
  0x85   :  { %v621_v6 = vor.u32 %v620_v11, %v619_v4  ;;  %vm625_vm0 = vcmp.lt.s32.totalorder %v606_v23, 1  ;;  %v469_v14 = vxor.u32 2147483648, %v468_v5  ;;  %vm627_vm1 = vcmp.lt.s32.totalorder %v606_v23, 3 }
  0x86   :  { %v2384_v12 = vadd.s32 4294967294, %v557_v17  ;;  %vm628_vm2 = vcmp.lt.s32.totalorder %v606_v23, 4  ;;  %v624_v55 = vor.u32 %v623_v21, %v622_v44  ;;  %vm626_vm3 = vcmp.lt.s32.totalorder %v606_v23, 2 }
  0x87   :  { %v630_v29 = vsel %vm628_vm2, %v618_v35, 2102212464  ;;  %v633_v16 = vsel %vm625_vm0, %v612_v9, %v615_v18  ;;  %v629_v57 = vsel %vm625_vm0, %v609_v43, %v612_v9  ;;  %v634_v41 = vsel %vm628_vm2, %v621_v6, 920167782 }
  0x88   :  { %vm2385_vm4 = vcmp.lt.s32.totalorder %v2384_v12, 0  ;;  %v631_v25 = vsel %vm627_vm1, %v615_v18, %v630_v29  ;;  %v635_v56 = vsel %vm627_vm1, %v618_v35, %v634_v41  ;;  %v637_v38 = vsel %vm625_vm0, %v615_v18, %v618_v35 }
  0x89   :  { %v560_v20 = vsel %vm2385_vm4, 0, %v2384_v12  ;;  %v638_v37 = vsel %vm628_vm2, %v624_v55, 1326507024  ;;  %v3037_v0 = vsel %vm3016_vm15, 0, %v472_v19  ;;  %v636_v30 = vsel %vm626_vm3, %v633_v16, %v635_v56 }
  0x8a   :  { %v565_v4 = vsub.s32 4294967266, %v560_v20  ;;  %v697_v11 = vand.u32 2147483647, %v2990_v22  ;;  %v545_v9 = vadd.s32 %v2924_v8, %v2950_v15  ;;  %v639_v44 = vsel %vm627_vm1, %v621_v6, %v638_v37 }
  0x8b   :  { %v3045_v17 = vmul.u32.u64.low %v3030_v13, %v636_v30  ;;  %v3046_v43 = vmul.u32.u64.high %v3030_v13, %v636_v30, %v3045_v17  ;;  %v3049_v18 = vpop.eup %2513  ;;  %v470_v19 = vsel %vm387_vm14, %v469_v14, %v468_v5  ;;  %v632_v35 = vsel %vm626_vm3, %v629_v57, %v631_v25 }
  0x8c   :  { %v640_v21 = vsel %vm626_vm3, %v637_v38, %v639_v44  ;;  %v2390_v12 = vadd.s32 4294967169, %v701_v47  ;;  %v561_v55 = vsub.s32 32, %v560_v20  ;;  %v566_v29 = vadd.s32 127, %v565_v4 }
  0x8d   :  { %v3056_v8 = vmul.u32.u64.low %v3030_v13, %v640_v21  ;;  %v3057_v15 = vmul.u32.u64.high %v3030_v13, %v640_v21, %v3056_v8  ;;  %v3063_v6 = vmul.f32 %v133_v2, %v2607_v7  ;;  %v3069_v5 = vmul.f32 %v140_v32, %v2607_v7 }
  0x8e   :  { %vm380_vm6 = vcmp.eq.s32.totalorder %v3002_v42, 2  ;;  %v707_v47 = vadd.s32 1, %v2390_v12  ;;  %v3072_v23 = vpop.eup %2515  ;;  %v478_v14 = vadd.s32 3, %v3037_v0  ;;  %v648_v16 = vmul.u32 %v3030_v13, %v632_v35 }
  0x8f   :  { %v651_v57 = vadd.s32 1, %v3046_v43  ;;  %v704_v36 = vand.u32 8388607, %v697_v11  ;;  %v3845_v2 = vxor.u32 2147483648, %v3049_v18  ;;  %v473_v7 = vsel %vm3016_vm15, %v2649_v50, %v470_v19 }
  0x90   :  { %v562_v3 = vshll.u32 %v3006_v53, %v560_v20  ;;  %vm708_vm7 = vcmp.gt.s32.totalorder %v707_v47, 0  ;;  %v563_v60 = vshrl.u32 %v545_v9, %v561_v55  ;;  %v567_v32 = vshll.u32 %v566_v29, 23 }
  0x91   :  { %vm650_vm8 = vc.u32 %v3057_v15, %v3045_v17  ;;  %v709_v13 = vsel %vm708_vm7, %v707_v47, 0  ;;  %vm377_vm9 = vcmp.eq.s32.totalorder %v3002_v42, 0  ;;  %v3846_v25 = vxor.u32 2147483648, %v3072_v23 }
  0x92   :  { %vm491_vm10 = vcmp.lt.s32.totalorder %v2779_v39, 0  ;;  %v652_v41 = vsel %vm650_vm8, %v651_v57, %v3046_v43  ;;  %2517 = vcosq.f32 %v473_v7  ;;  %v3090_v61 = vand.u32 3, %v478_v14 }
  0x93   :  { %v653_v56 = vadd.s32 %v652_v41, %v648_v16  ;;  %v711_v53 = vand.u32 31, %v709_v13  ;;  %v382_v20 = vsel %vm380_vm6, %v3845_v2, %v3072_v23  ;;  %2519 = vsinq.f32 %v473_v7 }
  0x94   :  { %v575_v38 = vsub.s32 4, %v2987_v27  ;;  %v705_v37 = vor.u32 8388608, %v704_v36  ;;  %v564_v4 = vor.u32 %v563_v60, %v562_v3  ;;  %v568_v30 = vor.u32 4788187, %v567_v32 }
  0x95   :  { %v654_v9 = vadd.s32 536870912, %v653_v56  ;;  %v712_v44 = vsub.s32 32, %v711_v53  ;;  %vm376_vm11 = vcmp.lt.s32.totalorder %v3002_v42, 2  ;;  %v379_v43 = vsel %vm377_vm9, %v3049_v18, %v3846_v25 }
  0x96   :  { %vm3106_vm12 = vcmp.le.f32.partialorder %v489_v10, 0.7853982  ;;  %v710_v35 = vshrl.u32 %v709_v13, 5  ;;  %v714_v21 = vshll.u32 %v3860_v24, %v711_v53  ;;  %v717_v12 = vshll.u32 %v3856_v26, %v711_v53 }
  0x97   :  { %v3112_v55 = vshrl.u32 %v654_v9, 30  ;;  %v715_v29 = vshrl.u32 %v3856_v26, %v712_v44  ;;  %v718_v8 = vshrl.u32 %v3858_v28, %v712_v44  ;;  %v720_v47 = vshll.u32 %v3858_v28, %v711_v53 }
  0x98   :  { %v576_v10 = vsel %vm491_vm10, %v575_v38, %v2987_v27  ;;  %v721_v14 = vshrl.u32 %v3850_v31, %v712_v44  ;;  %v723_v16 = vshll.u32 %v3850_v31, %v711_v53  ;;  %v724_v57 = vshrl.u32 %v3879_v33, %v712_v44 }
  0x99   :  { %v569_v36 = vand.u32 2147483647, %v568_v30  ;;  %v571_v7 = vcvt.s32.f32 %v564_v4  ;;  %v656_v3 = vshll.u32 %v3112_v55, 30  ;;  %v804_v60 = vand.u32 2139095040, %v3063_v6 }
  0x9a   :  { %v716_v32 = vor.u32 %v715_v29, %v714_v21  ;;  %v719_v13 = vor.u32 %v718_v8, %v717_v12  ;;  %v725_v41 = vor.u32 %v724_v57, %v723_v16  ;;  %vm729_vm13 = vcmp.lt.s32.totalorder %v710_v35, 1 }
  0x9b   :  { %v3125_v9 = vsub.s32 %v653_v56, %v656_v3  ;;  %v713_v27 = vshrl.u32 %v3860_v24, %v712_v44  ;;  %v722_v38 = vor.u32 %v721_v14, %v720_v47  ;;  %v726_v2 = vshll.u32 %v3879_v33, %v711_v53 }
  0x9c   :  { %v727_v25 = vshrl.u32 %v3862_v45, %v712_v44  ;;  %vm731_vm14 = vcmp.lt.s32.totalorder %v710_v35, 3  ;;  %vm732_vm15 = vcmp.lt.s32.totalorder %v710_v35, 4  ;;  %v745_v4 = vshll.u32 %v705_v37, 8 }
  0x9d   :  { %vm373_vm0 = vweird.f32 %v2646_v49  ;;  %v572_v30 = vmul.f32 %v571_v7, %v569_v36  ;;  %v659_v21 = vsub.s32 0, %v3125_v9  ;;  %vm730_vm1 = vcmp.lt.s32.totalorder %v710_v35, 2 }
  0x9e   :  { %v734_v12 = vsel %vm732_vm15, %v722_v38, 2102212464  ;;  %v728_v56 = vor.u32 %v727_v25, %v726_v2  ;;  %v737_v29 = vsel %vm729_vm13, %v716_v32, %v719_v13  ;;  %v738_v8 = vsel %vm732_vm15, %v725_v41, 920167782 }
  0x9f   :  { %v805_v47 = vshrl.u32 %v804_v60, 23  ;;  %v3137_v53 = vsel %vm3106_vm12, 0, %v576_v10  ;;  %v2387_v37 = vmin.u32 %v659_v21, %v3125_v9  ;;  %v733_v44 = vsel %vm729_vm13, %v713_v27, %v716_v32  ;;  %v3142_v16 = vpop.eup %2517 }
  0xa0   :  { %v739_v14 = vsel %vm731_vm14, %v722_v38, %v738_v8  ;;  %3906 = vst [vmem:[#allocation9_spill] sm:$0xff] %v3142_v16  ;;  %v735_v57 = vsel %vm731_vm14, %v719_v13, %v734_v12  ;;  %v741_v25 = vsel %vm729_vm13, %v719_v13, %v722_v38  ;;  %v742_v36 = vsel %vm732_vm15, %v728_v56, 1326507024  ;;  %v3148_v7 = vpop.eup %2519 }
  0xa1   :  { %v740_v2 = vsel %vm730_vm1, %v737_v29, %v739_v14  ;;  %v383_v10 = vsel %vm376_vm11, %v379_v43, %v382_v20  ;;  %vm481_vm2 = vcmp.eq.s32.totalorder %v3090_v61, 0  ;;  %v573_v3 = vxor.u32 2147483648, %v572_v30 }
  0xa2   :  { %v661_v60 = vclz %v2387_v37  ;;  %v743_v32 = vsel %vm731_vm14, %v725_v41, %v742_v36  ;;  %v3154_v27 = vmul.u32.u64.low %v745_v4, %v740_v2  ;;  %v3155_v21 = vmul.u32.u64.high %v745_v4, %v740_v2, %v3154_v27 }
  0xa3   :  { %v2394_v12 = vadd.s32 4294967169, %v805_v47  ;;  %v582_v13 = vadd.s32 3, %v3137_v53  ;;  %v736_v56 = vsel %vm730_vm1, %v733_v44, %v735_v57  ;;  %v744_v29 = vsel %vm730_vm1, %v741_v25, %v743_v32 }
  0xa4   :  { %v2388_v38 = vadd.s32 4294967294, %v661_v60  ;;  %v3847_v42 = vxor.u32 2147483648, %v3142_v16  ;;  %v3162_v20 = vmul.u32.u64.low %v745_v4, %v744_v29  ;;  %v3163_v43 = vmul.u32.u64.high %v745_v4, %v744_v29, %v3162_v20 }
  0xa5   :  { %v811_v8 = vadd.s32 1, %v2394_v12  ;;  %v3848_v41 = vxor.u32 2147483648, %v3148_v7  ;;  %v574_v37 = vsel %vm491_vm10, %v573_v3, %v572_v30  ;;  %v649_v47 = vadd.s32 %v3045_v17, %v3057_v15 }
  0xa6   :  { %vm2389_vm3 = vcmp.lt.s32.totalorder %v2388_v38, 0  ;;  %v752_v2 = vmul.u32 %v745_v4, %v736_v56  ;;  %v755_v35 = vadd.s32 1, %v3155_v21  ;;  %v3174_v60 = vsel %vm373_vm0, nan, %v383_v10 }
  0xa7   :  { %v664_v14 = vsel %vm2389_vm3, 0, %v2388_v38  ;;  %vm812_vm4 = vcmp.gt.s32.totalorder %v811_v8, 0  ;;  %vm484_vm6 = vcmp.eq.s32.totalorder %v3090_v61, 2  ;;  %vm595_vm7 = vcmp.lt.s32.totalorder %v2904_v34, 0 }
  0xa8   :  { %v665_v44 = vsub.s32 32, %v664_v14  ;;  %v666_v57 = vshll.u32 %v3125_v9, %v664_v14  ;;  %v669_v25 = vsub.s32 4294967266, %v664_v14  ;;  %v813_v36 = vsel %vm812_vm4, %v811_v8, 0 }
  0xa9   :  { %vm754_vm8 = vc.u32 %v3163_v43, %v3154_v27  ;;  %v577_v17 = vsel %vm3106_vm12, %v2779_v39, %v574_v37  ;;  %v3184_v30 = vand.u32 3, %v582_v13  ;;  %v3852_v10 = vand.u32 2147483647, %v3063_v6 }
  0xaa   :  { %v667_v15 = vshrl.u32 %v649_v47, %v665_v44  ;;  %v670_v4 = vadd.s32 127, %v669_v25  ;;  %v756_v9 = vsel %vm754_vm8, %v755_v35, %v3155_v21  ;;  %v815_v32 = vand.u32 31, %v813_v36 }
  0xab   :  { %v757_v3 = vadd.s32 %v756_v9, %v752_v2  ;;  %v3192_v12 = vsel %vm481_vm2, %v3142_v16, %v3848_v41  ;;  %v3197_v19 = vsel %vm484_vm6, %v3847_v42, %v3148_v7  ;;  %vm3201_vm9 = vcmp.le.f32.partialorder %v593_v59, 0.7853982 }
  0xac   :  { %v668_v13 = vor.u32 %v667_v15, %v666_v57  ;;  %v671_v38 = vshll.u32 %v670_v4, 23  ;;  %2521 = vcosq.f32 %v577_v17  ;;  %v679_v56 = vsub.s32 4, %v3112_v55 }
  0xad   :  { %v758_v29 = vadd.s32 536870912, %v757_v3  ;;  %v816_v20 = vsub.s32 32, %v815_v32  ;;  %v814_v47 = vshrl.u32 %v813_v36, 5  ;;  %v818_v14 = vshll.u32 %v3860_v24, %v815_v32 }
  0xae   :  { %v672_v8 = vor.u32 4788187, %v671_v38  ;;  %v675_v37 = vcvt.s32.f32 %v668_v13  ;;  %v821_v59 = vshll.u32 %v3856_v26, %v815_v32  ;;  %v824_v25 = vshll.u32 %v3858_v28, %v815_v32 }
  0xaf   :  { %v3207_v2 = vshrl.u32 %v758_v29, 30  ;;  %v819_v35 = vshrl.u32 %v3856_v26, %v816_v20  ;;  %v822_v44 = vshrl.u32 %v3858_v28, %v816_v20  ;;  %v825_v15 = vshrl.u32 %v3850_v31, %v816_v20 }
  0xb0   :  { %v673_v57 = vand.u32 2147483647, %v672_v8  ;;  %v827_v4 = vshll.u32 %v3850_v31, %v815_v32  ;;  %2523 = vsinq.f32 %v577_v17  ;;  %v680_v36 = vsel %vm595_vm7, %v679_v56, %v3112_v55 }
  0xb1   :  { %v760_v9 = vshll.u32 %v3207_v2, 30  ;;  %v808_v13 = vand.u32 8388607, %v3852_v10  ;;  %v828_v29 = vshrl.u32 %v3879_v33, %v816_v20  ;;  %v830_v8 = vshll.u32 %v3879_v33, %v815_v32 }
  0xb2   :  { %v676_v38 = vmul.f32 %v675_v37, %v673_v57  ;;  %vm833_vm10 = vcmp.lt.s32.totalorder %v814_v47, 1  ;;  %vm480_vm11 = vcmp.lt.s32.totalorder %v3090_v61, 2  ;;  %v820_v17 = vor.u32 %v819_v35, %v818_v14 }
  0xb3   :  { %v3224_v42 = vsub.s32 %v757_v3, %v760_v9  ;;  %v823_v41 = vor.u32 %v822_v44, %v821_v59  ;;  %v831_v54 = vshrl.u32 %v3862_v45, %v816_v20  ;;  %v817_v55 = vshrl.u32 %v3860_v24, %v816_v20 }
  0xb4   :  { %v826_v56 = vor.u32 %v825_v15, %v824_v25  ;;  %v829_v31 = vor.u32 %v828_v29, %v827_v4  ;;  %vm836_vm12 = vcmp.lt.s32.totalorder %v814_v47, 4  ;;  %v677_v10 = vxor.u32 2147483648, %v676_v38 }
  0xb5   :  { %v3230_v37 = vsel %vm3201_vm9, 0, %v680_v36  ;;  %v763_v32 = vsub.s32 0, %v3224_v42  ;;  %vm835_vm13 = vcmp.lt.s32.totalorder %v814_v47, 3  ;;  %v809_v57 = vor.u32 8388608, %v808_v13 }
  0xb6   :  { %3909 = vst [vmem:[#allocation10_spill] sm:$0xff] %v3230_v37  ;;  %v832_v3 = vor.u32 %v831_v54, %v830_v8  ;;  %v838_v14 = vsel %vm836_vm12, %v826_v56, 2102212464  ;;  %v842_v35 = vsel %vm836_vm12, %v829_v31, 920167782  ;;  %vm834_vm14 = vcmp.lt.s32.totalorder %v814_v47, 2 }
  0xb7   :  { %v2391_v59 = vmin.u32 %v763_v32, %v3224_v42  ;;  %v841_v20 = vsel %vm833_vm10, %v820_v17, %v823_v41  ;;  %v908_v44 = vand.u32 2139095040, %v3069_v5  ;;  %vm699_vm15 = vcmp.lt.s32.totalorder %v2990_v22, 0 }
  0xb8   :  { %v837_v25 = vsel %vm833_vm10, %v817_v55, %v820_v17  ;;  %v839_v15 = vsel %vm835_vm13, %v823_v41, %v838_v14  ;;  %v843_v4 = vsel %vm835_vm13, %v826_v56, %v842_v35  ;;  %v3855_v54 = vand.u32 2147483647, %v3069_v5 }
  0xb9   :  { %v678_v36 = vsel %vm595_vm7, %v677_v10, %v676_v38  ;;  %v753_v9 = vadd.s32 %v3154_v27, %v3163_v43  ;;  %v765_v13 = vclz %v2391_v59  ;;  %v845_v29 = vsel %vm833_vm10, %v823_v41, %v826_v56  ;;  %v3248_v8 = vpop.eup %2521 }
  0xba   :  { %3910 = vst [vmem:[#allocation11_spill] sm:$0xff] %v3248_v8  ;;  %vm477_vm1 = vweird.f32 %v2649_v50  ;;  %v783_v17 = vsub.s32 4, %v3207_v2  ;;  %v844_v55 = vsel %vm834_vm14, %v841_v20, %v843_v4  ;;  %v846_v32 = vsel %vm836_vm12, %v832_v3, 1326507024 }
  0xbb   :  { %v849_v14 = vshll.u32 %v809_v57, 8  ;;  %vm3256_vm2 = vcmp.le.f32.partialorder %v697_v11, 0.7853982  ;;  %v2392_v27 = vadd.s32 4294967294, %v765_v13  ;;  %v840_v43 = vsel %vm834_vm14, %v837_v25, %v839_v15 }
  0xbc   :  { %v847_v41 = vsel %vm835_vm13, %v829_v31, %v846_v32  ;;  %v909_v38 = vshrl.u32 %v908_v44, 23  ;;  %v681_v56 = vsel %vm3201_vm9, %v2904_v34, %v678_v36  ;;  %v487_v31 = vsel %vm480_vm11, %v3192_v12, %v3197_v19 }
  0xbd   :  { %v848_v35 = vsel %vm834_vm14, %v845_v29, %v847_v41  ;;  %v3266_v3 = vmul.u32.u64.low %v849_v14, %v844_v55  ;;  %v3267_v57 = vmul.u32.u64.high %v849_v14, %v844_v55, %v3266_v3  ;;  %vm2393_vm3 = vcmp.lt.s32.totalorder %v2392_v27, 0  ;;  %v3272_v4 = vpop.eup %2523 }
  0xbe   :  { %v3269_v11 = vmul.u32.u64.low %v849_v14, %v848_v35  ;;  %v3270_v59 = vmul.u32.u64.high %v849_v14, %v848_v35, %v3269_v11  ;;  %v2398_v20 = vadd.s32 4294967169, %v909_v38  ;;  %3913 = vst [vmem:[#allocation12_spill] sm:$0xff] %v3272_v4  ;;  %vm588_vm4 = vcmp.eq.s32.totalorder %v3184_v30, 2 }
  0xbf   :  { %v768_v21 = vsel %vm2393_vm3, 0, %v2392_v27  ;;  %v856_v47 = vmul.u32 %v849_v14, %v840_v43  ;;  %2525 = vcosq.f32 %v681_v56  ;;  %v686_v13 = vadd.s32 3, %v3230_v37 }
  0xc0   :  { %v769_v44 = vsub.s32 32, %v768_v21  ;;  %v770_v25 = vshll.u32 %v3224_v42, %v768_v21  ;;  %v773_v15 = vsub.s32 4294967266, %v768_v21  ;;  %v915_v36 = vadd.s32 1, %v2398_v20 }
  0xc1   :  { %v859_v29 = vadd.s32 1, %v3267_v57  ;;  %v912_v55 = vand.u32 8388607, %v3855_v54  ;;  %v784_v12 = vsel %vm699_vm15, %v783_v17, %v3207_v2  ;;  %vm858_vm6 = vc.u32 %v3270_v59, %v3266_v3 }
  0xc2   :  { %v771_v32 = vshrl.u32 %v753_v9, %v769_v44  ;;  %v774_v61 = vadd.s32 127, %v773_v15  ;;  %v3854_v42 = vxor.u32 2147483648, %v3272_v4  ;;  %v3853_v19 = vxor.u32 2147483648, %v3248_v8 }
  0xc3   :  { %v860_v14 = vsel %vm858_vm6, %v859_v29, %v3267_v57  ;;  %vm916_vm7 = vcmp.gt.s32.totalorder %v915_v36, 0  ;;  %vm585_vm8 = vcmp.eq.s32.totalorder %v3184_v30, 0  ;;  %v3294_v9 = vsel %vm3256_vm2, 0, %v784_v12 }
  0xc4   :  { %v772_v27 = vor.u32 %v771_v32, %v770_v25  ;;  %v775_v43 = vshll.u32 %v774_v61, 23  ;;  %v861_v41 = vadd.s32 %v860_v14, %v856_v47  ;;  %v917_v38 = vsel %vm916_vm7, %v915_v36, 0  ;;  %3914 = vst [vmem:[#allocation13_spill] sm:$0xff] %v3294_v9 }
  0xc5   :  { %v913_v2 = vor.u32 8388608, %v912_v55  ;;  %v919_v17 = vand.u32 31, %v917_v38  ;;  %v3298_v35 = vsel %vm477_vm1, nan, %v487_v31  ;;  %v3305_v21 = vsel %vm588_vm4, %v3853_v19, %v3272_v4 }
  0xc6   :  { %v776_v11 = vor.u32 4788187, %v775_v43  ;;  %v779_v20 = vcvt.s32.f32 %v772_v27  ;;  %v862_v57 = vadd.s32 536870912, %v861_v41  ;;  %v3307_v47 = vand.u32 3, %v686_v13 }
  0xc7   :  { %v920_v44 = vsub.s32 32, %v919_v17  ;;  %v1012_v25 = vand.u32 2139095040, %v2652_v51  ;;  %v3313_v31 = vsel %vm585_vm8, %v3248_v8, %v3854_v42  ;;  %v3316_v36 = vadd.s32 3, %v3294_v9 }
  0xc8   :  { %v777_v15 = vand.u32 2147483647, %v776_v11  ;;  %v3318_v29 = vshrl.u32 %v862_v57, 30  ;;  %2527 = vsinq.f32 %v681_v56  ;;  %v3321_v55 = vadd.s32 %v3266_v3, %v3270_v59 }
  0xc9   :  { %v3323_v13 = vshll.u32 %v913_v2, 8  ;;  %v3865_v32 = vand.u32 2147483647, %v2652_v51  ;;  %v922_v14 = vshll.u32 %v3860_v24, %v919_v17  ;;  %v923_v27 = vshrl.u32 %v3856_v26, %v920_v44 }
  0xca   :  { %v780_v61 = vmul.f32 %v779_v20, %v777_v15  ;;  %v864_v12 = vshll.u32 %v3318_v29, 30  ;;  %v918_v43 = vshrl.u32 %v917_v38, 5  ;;  %v925_v11 = vshll.u32 %v3856_v26, %v919_v17 }
  0xcb   :  { %v926_v57 = vshrl.u32 %v3858_v28, %v920_v44  ;;  %v1013_v56 = vshrl.u32 %v1012_v25, 23  ;;  %v928_v59 = vshll.u32 %v3858_v28, %v919_v17  ;;  %v3915_v2 = vmov 2102212464  }
  0xcc   :  { %v781_v19 = vxor.u32 2147483648, %v780_v61  ;;  %v3331_v3 = vsub.s32 %v861_v41, %v864_v12  ;;  %v929_v42 = vshrl.u32 %v3915_v2, %v920_v44  ;;  %v921_v20 = vshrl.u32 %v3860_v24, %v920_v44  ;;  %v3342_v26 = vpop.eup %2525 }
  0xcd   :  { %v931_v15 = vshll.u32 %v3915_v2, %v919_v17  ;;  %v932_v54 = vshrl.u32 %v3879_v33, %v920_v44  ;;  %v3340_v38 = vand.u32 8388607, %v3865_v32  ;;  %3916 = vst [vmem:[#allocation14_spill] sm:$0xff] %v3342_v26  ;;  %vm584_vm9 = vcmp.lt.s32.totalorder %v3184_v30, 2 }
  0xce   :  { %v782_v41 = vsel %vm699_vm15, %v781_v19, %v780_v61  ;;  %v867_v25 = vsub.s32 0, %v3331_v3  ;;  %v924_v12 = vor.u32 %v923_v27, %v922_v14  ;;  %v934_v28 = vshll.u32 %v3879_v33, %v919_v17 }
  0xcf   :  { %v785_v24 = vsel %vm3256_vm2, %v2990_v22, %v782_v41  ;;  %v927_v45 = vor.u32 %v926_v57, %v925_v11  ;;  %v933_v50 = vor.u32 %v932_v54, %v931_v15  ;;  %v3917_v32 = vmov 1326507024  }
  0xd0   :  { %v935_v49 = vshrl.u32 %v3917_v32, %v920_v44  ;;  %v2395_v9 = vmin.u32 %v867_v25, %v3331_v3  ;;  %v930_v37 = vor.u32 %v929_v42, %v928_v59  ;;  %vm937_vm10 = vcmp.lt.s32.totalorder %v918_v43, 1 }
  0xd1   :  { %v2402_v8 = vadd.s32 4294967169, %v1013_v56  ;;  %vm692_vm11 = vcmp.eq.s32.totalorder %v3307_v47, 2  ;;  %v3871_v19 = vxor.u32 2147483648, %v3342_v26  ;;  %vm939_vm12 = vcmp.lt.s32.totalorder %v918_v43, 3 }
  0xd2   :  { %v936_v61 = vor.u32 %v935_v49, %v934_v28  ;;  %vm940_vm13 = vcmp.lt.s32.totalorder %v918_v43, 4  ;;  %2529 = vcosq.f32 %v785_v24  ;;  %v869_v17 = vclz %v2395_v9 }
  0xd3   :  { %v887_v10 = vsub.s32 4, %v3318_v29  ;;  %vm938_vm14 = vcmp.lt.s32.totalorder %v918_v43, 2  ;;  %vm803_vm15 = vcmp.lt.s32.totalorder %v3063_v6, 0  ;;  %v941_v54 = vsel %vm937_vm10, %v921_v20, %v924_v12 }
  0xd4   :  { %v942_v42 = vsel %vm940_vm13, %v930_v37, 2102212464  ;;  %v945_v44 = vsel %vm937_vm10, %v924_v12, %v927_v45  ;;  %v946_v14 = vsel %vm940_vm13, %v933_v50, 920167782  ;;  %v2396_v27 = vadd.s32 4294967294, %v869_v17 }
  0xd5   :  { %v943_v49 = vsel %vm939_vm12, %v927_v45, %v942_v42  ;;  %v947_v28 = vsel %vm939_vm12, %v930_v37, %v946_v14  ;;  %v949_v9 = vsel %vm937_vm10, %v927_v45, %v930_v37  ;;  %2531 = vsinq.f32 %v785_v24  ;;  %v3367_v59 = vpop.eup %2527 }
  0xd6   :  { %v948_v11 = vsel %vm938_vm14, %v945_v44, %v947_v28  ;;  %v950_v57 = vsel %vm940_vm13, %v936_v61, 1326507024  ;;  %v1019_v56 = vadd.s32 1, %v2402_v8  ;;  %3918 = vst [vmem:[#allocation15_spill] sm:$0xff] %v3367_v59  ;;  %vm689_vm2 = vcmp.eq.s32.totalorder %v3307_v47, 0 }
  0xd7   :  { %v3919_v20 = vand.u32 2147483647, %v3063_v6  ;;  %vm2397_vm4 = vcmp.lt.s32.totalorder %v2396_v27, 0  ;;  %v951_v41 = vsel %vm939_vm12, %v933_v50, %v950_v57  ;;  %v944_v8 = vsel %vm938_vm14, %v941_v54, %v943_v49 }
  0xd8   :  { %v3378_v24 = vmul.u32.u64.low %v3323_v13, %v948_v11  ;;  %v3379_v45 = vmul.u32.u64.high %v3323_v13, %v948_v11, %v3378_v24  ;;  %v872_v37 = vsel %vm2397_vm4, 0, %v2396_v27  ;;  %v952_v25 = vsel %vm938_vm14, %v949_v9, %v951_v41 }
  0xd9   :  { %vm3372_vm3 = vcmp.le.f32.partialorder %v3919_v20, 0.7853982  ;;  %vm1020_vm6 = vcmp.gt.s32.totalorder %v1019_v56, 0  ;;  %v873_v12 = vsub.s32 32, %v872_v37  ;;  %v874_v61 = vshll.u32 %v3331_v3, %v872_v37 }
  0xda   :  { %v877_v17 = vsub.s32 4294967266, %v872_v37  ;;  %v1021_v42 = vsel %vm1020_vm6, %v1019_v56, 0  ;;  %v3389_v50 = vsel %vm584_vm9, %v3313_v31, %v3305_v21  ;;  %v3396_v43 = vand.u32 3, %v3316_v36 }
  0xdb   :  { %v3392_v44 = vmul.u32.u64.low %v3323_v13, %v952_v25  ;;  %v3393_v14 = vmul.u32.u64.high %v3323_v13, %v952_v25, %v3392_v44  ;;  %v1023_v27 = vand.u32 31, %v1021_v42  ;;  %v875_v54 = vshrl.u32 %v3321_v55, %v873_v12 }
  0xdc   :  { %v878_v49 = vadd.s32 127, %v877_v17  ;;  %v963_v3 = vadd.s32 1, %v3379_v45  ;;  %v3878_v28 = vxor.u32 2147483648, %v3367_v59  ;;  %v960_v9 = vmul.u32 %v3323_v13, %v944_v8 }
  0xdd   :  { %v1017_v30 = vor.u32 8388608, %v3340_v38  ;;  %v1024_v21 = vsub.s32 32, %v1023_v27  ;;  %v3408_v31 = vsel %vm692_vm11, %v3871_v19, %v3367_v59  ;;  %v876_v36 = vor.u32 %v875_v54, %v874_v61 }
  0xde   :  { %v879_v11 = vshll.u32 %v878_v49, 23  ;;  %v888_v55 = vsel %vm803_vm15, %v887_v10, %v3318_v29  ;;  %vm962_vm7 = vc.u32 %v3393_v14, %v3378_v24  ;;  %v3922_v13 = vmov 683565275  }
  0xdf   :  { %v1026_v57 = vshll.u32 %v3922_v13, %v1023_v27  ;;  %v3923_v38 = vmov 2475754826   ;;  %v1035_v20 = vshll.u32 %v3915_v2, %v1023_v27  ;;  %v883_v37 = vcvt.s32.f32 %v876_v36  ;;  %v3420_v12 = vpop.eup %2529 }
  0xe0   :  { %v1029_v56 = vshll.u32 %v3923_v38, %v1023_v27  ;;  %v880_v41 = vor.u32 4788187, %v879_v11  ;;  %v964_v8 = vsel %vm962_vm7, %v963_v3, %v3379_v45  ;;  %v1027_v25 = vshrl.u32 %v3923_v38, %v1024_v21 }
  0xe1   :  { %v3424_v29 = vsel %vm3372_vm3, 0, %v888_v55  ;;  %v965_v10 = vadd.s32 %v964_v8, %v960_v9  ;;  %v3426_v61 = vshrl.u32 %v1021_v42, 5  ;;  %v3924_v17 = vmov 2131351028  }
  0xe2   :  { %v1030_v44 = vshrl.u32 %v3924_v17, %v1024_v21  ;;  %vm581_vm8 = vweird.f32 %v2779_v39  ;;  %v881_v54 = vand.u32 2147483647, %v880_v41  ;;  %v1032_v49 = vshll.u32 %v3924_v17, %v1023_v27  ;;  %v3441_v55 = vpop.eup %2531 }
  0xe3   :  { %v1033_v45 = vshrl.u32 %v3915_v2, %v1024_v21  ;;  %v1036_v3 = vshrl.u32 %v3879_v33, %v1024_v21  ;;  %vm688_vm9 = vcmp.lt.s32.totalorder %v3307_v47, 2  ;;  %v691_v42 = vsel %vm689_vm2, %v3342_v26, %v3878_v28 }
  0xe4   :  { %v966_v9 = vadd.s32 536870912, %v965_v10  ;;  %v1038_v36 = vshll.u32 %v3879_v33, %v1023_v27  ;;  %v1039_v11 = vshrl.u32 %v3917_v32, %v1024_v21  ;;  %vm793_vm10 = vcmp.eq.s32.totalorder %v3396_v43, 0 }
  0xe5   :  { %vm796_vm11 = vcmp.eq.s32.totalorder %v3396_v43, 2  ;;  %v884_v41 = vmul.f32 %v883_v37, %v881_v54  ;;  %v1028_v8 = vor.u32 %v1027_v25, %v1026_v57  ;;  %v1031_v19 = vor.u32 %v1030_v44, %v1029_v56 }
  0xe6   :  { %v1037_v4 = vor.u32 %v1036_v3, %v1035_v20  ;;  %v894_v59 = vadd.s32 3, %v3424_v29  ;;  %v967_v16 = vshrl.u32 %v966_v9, 30  ;;  %vm1041_vm12 = vcmp.lt.s32.totalorder %v3426_v61, 1 }
  0xe7   :  { %v3447_v28 = vshll.u32 %v1017_v30, 8  ;;  %vm685_vm13 = vweird.f32 %v2904_v34  ;;  %v885_v27 = vxor.u32 2147483648, %v884_v41  ;;  %v1025_v33 = vshrl.u32 %v3922_v13, %v1024_v21 }
  0xe8   :  { %v1034_v26 = vor.u32 %v1033_v45, %v1032_v49  ;;  %vm1044_vm14 = vcmp.lt.s32.totalorder %v3426_v61, 4  ;;  %v3886_v37 = vxor.u32 2147483648, %v3420_v12  ;;  %vm907_vm2 = vcmp.lt.s32.totalorder %v3069_v5, 0 }
  0xe9   :  { %v968_v57 = vshll.u32 %v967_v16, 30  ;;  %v1040_v56 = vor.u32 %v1039_v11, %v1038_v36  ;;  %vm1043_vm4 = vcmp.lt.s32.totalorder %v3426_v61, 3  ;;  %v886_v30 = vsel %vm803_vm15, %v885_v27, %v884_v41 }
  0xea   :  { %vm1042_vm6 = vcmp.lt.s32.totalorder %v3426_v61, 2  ;;  %v1049_v20 = vsel %vm1041_vm12, %v1028_v8, %v1031_v19  ;;  %v1050_v21 = vsel %vm1044_vm14, %v1037_v4, 920167782  ;;  %v3887_v25 = vxor.u32 2147483648, %v3441_v55 }
  0xeb   :  { %v889_v44 = vsel %vm3372_vm3, %v3063_v6, %v886_v30  ;;  %v3466_v54 = vsub.s32 %v965_v10, %v968_v57  ;;  %v1046_v49 = vsel %vm1044_vm14, %v1034_v26, 2102212464  ;;  %v3925_v45 = vand.u32 2147483647, %v3069_v5 }
  0xec   :  { %2533 = vcosq.f32 %v889_v44  ;;  %v991_v9 = vsub.s32 4, %v967_v16  ;;  %v1045_v36 = vsel %vm1041_vm12, %v1025_v33, %v1028_v8  ;;  %v1051_v15 = vsel %vm1043_vm4, %v1034_v26, %v1050_v21 }
  0xed   :  { %vm3472_vm15 = vcmp.le.f32.partialorder %v3925_v45, 0.7853982  ;;  %2535 = vsinq.f32 %v889_v44  ;;  %v971_v10 = vsub.s32 0, %v3466_v54  ;;  %v1052_v11 = vsel %vm1042_vm6, %v1049_v20, %v1051_v15 }
  0xee   :  { %v1053_v41 = vsel %vm1041_vm12, %v1031_v19, %v1034_v26  ;;  %vm789_vm3 = vweird.f32 %v2990_v22  ;;  %v1047_v27 = vsel %vm1043_vm4, %v1031_v19, %v1046_v49  ;;  %v1054_v33 = vsel %vm1044_vm14, %v1040_v56, 1326507024 }
  0xef   :  { %v3491_v8 = vmul.u32.u64.low %v3447_v28, %v1052_v11  ;;  %v3492_v57 = vmul.u32.u64.high %v3447_v28, %v1052_v11, %v3491_v8  ;;  %v3497_v30 = vsel %vm581_vm8, nan, %v3389_v50  ;;  %vm792_vm7 = vcmp.lt.s32.totalorder %v3396_v43, 2 }
  0xf0   :  { %v2399_v26 = vmin.u32 %v971_v10, %v3466_v54  ;;  %v1055_v20 = vsel %vm1043_vm4, %v1037_v4, %v1054_v33  ;;  %v695_v19 = vsel %vm688_vm9, %v691_v42, %v3408_v31  ;;  %v3506_v56 = vand.u32 3, %v894_v59 }
  0xf1   :  { %v1056_v21 = vsel %vm1042_vm6, %v1053_v41, %v1055_v20  ;;  %v1116_v44 = vand.u32 2139095040, %v2655_v52  ;;  %v795_v50 = vsel %vm793_vm10, %v3420_v12, %v3887_v25  ;;  %v798_v4 = vsel %vm796_vm11, %v3886_v37, %v3441_v55 }
  0xf2   :  { %v973_v47 = vclz %v2399_v26  ;;  %v1048_v59 = vsel %vm1042_vm6, %v1045_v36, %v1047_v27  ;;  %v992_v31 = vsel %vm907_vm2, %v991_v9, %v967_v16  ;;  %v3883_v45 = vand.u32 2147483647, %v2655_v52 }
  0xf3   :  { %v3526_v42 = vmul.u32.u64.low %v3447_v28, %v1056_v21  ;;  %v3527_v49 = vmul.u32.u64.high %v3447_v28, %v1056_v21, %v3526_v42  ;;  %v3532_v15 = vsel %vm685_vm13, nan, %v695_v19  ;;  %v1067_v11 = vadd.s32 1, %v3492_v57 }
  0xf4   :  { %v2400_v10 = vadd.s32 4294967294, %v973_v47  ;;  %v1117_v41 = vshrl.u32 %v1116_v44, 23  ;;  %v799_v61 = vsel %vm792_vm7, %v795_v50, %v798_v4  ;;  %vm897_vm9 = vcmp.eq.s32.totalorder %v3506_v56, 0 }
  0xf5   :  { %v961_v16 = vadd.s32 %v3378_v24, %v3393_v14  ;;  %v1064_v9 = vmul.u32 %v3447_v28, %v1048_v59  ;;  %v3543_v36 = vsel %vm3472_vm15, 0, %v992_v31  ;;  %v2583_v33 = vmov 1983009808  }
  0xf6   :  { %vm2401_vm10 = vcmp.lt.s32.totalorder %v2400_v10, 0  ;;  %v2406_v27 = vadd.s32 4294967169, %v1117_v41  ;;  %v1230_v26 = vunpack.c.l.s4 %v2583_v33  ;;  %v3546_v19 = vadd.s32 %v3491_v8, %v3527_v49 }
  0xf7   :  { %v976_v20 = vsel %vm2401_vm10, 0, %v2400_v10  ;;  %vm1066_vm11 = vc.u32 %v3527_v49, %v3491_v8  ;;  %v1120_v43 = vand.u32 8388607, %v3883_v45  ;;  %vm896_vm12 = vcmp.lt.s32.totalorder %v3506_v56, 2 }
  0xf8   :  { %v977_v24 = vsub.s32 32, %v976_v20  ;;  %v978_v14 = vshll.u32 %v3466_v54, %v976_v20  ;;  %v981_v28 = vsub.s32 4294967266, %v976_v20  ;;  %v1068_v21 = vsel %vm1066_vm11, %v1067_v11, %v3492_v57 }
  0xf9   :  { %vm900_vm14 = vcmp.eq.s32.totalorder %v3506_v56, 2  ;;  %v998_v44 = vadd.s32 3, %v3543_v36  ;;  %v1069_v50 = vadd.s32 %v1068_v21, %v1064_v9  ;;  %v1123_v4 = vadd.s32 1, %v2406_v27  ;;  %v3556_v47 = vpop.eup %2533 }
  0xfa   :  { %v3560_v8 = vsel %vm789_vm3, nan, %v799_v61  ;;  %v979_v59 = vshrl.u32 %v961_v16, %v977_v24  ;;  %v982_v31 = vadd.s32 127, %v981_v28  ;;  %v1231_v42 = vunpack.c.0.s8 %v1230_v26  ;;  %v3562_v49 = vpop.eup %2535 }
  0xfb   :  { %v3884_v54 = vxor.u32 2147483648, %v3556_v47  ;;  %v1070_v57 = vadd.s32 536870912, %v1069_v50  ;;  %v1121_v10 = vor.u32 8388608, %v1120_v43  ;;  %vm1124_vm4 = vcmp.gt.s32.totalorder %v1123_v4, 0 }
  0xfc   :  { %v3885_v11 = vxor.u32 2147483648, %v3562_v49  ;;  %v980_v41 = vor.u32 %v979_v59, %v978_v14  ;;  %v983_v9 = vshll.u32 %v982_v31, 23  ;;  %v1125_v27 = vsel %vm1124_vm4, %v1123_v4, 0 }
  0xfd   :  { %v3566_v33 = vand.u32 3, %v998_v44  ;;  %v1071_v20 = vshrl.u32 %v1070_v57, 30  ;;  %v1127_v61 = vand.u32 31, %v1125_v27  ;;  %v1227_v16 = vcombine.low %v2979_v62, %v3174_v60 }
  0xfe   :  { %v984_v26 = vor.u32 4788187, %v983_v9  ;;  %v987_v24 = vcvt.s32.f32 %v980_v41  ;;  %v3573_v43 = vsub.s32 %v1231_v42, %v2597_v1  ;;  %vm1011_vm6 = vcmp.lt.s32.totalorder %v2652_v51, 0 }
  0xff   :  { %v1072_v14 = vshll.u32 %v1071_v20, 30  ;;  %v1128_v21 = vsub.s32 32, %v1127_v61  ;;  %v3576_v4 = vshll.u32 %v1121_v10, 8  ;;  %v3579_v44 = vand.u32 3, %v2865_v58 }
 0x100   :  { %v899_v62 = vsel %vm897_vm9, %v3556_v47, %v3885_v11  ;;  %v902_v1 = vsel %vm900_vm14, %v3884_v54, %v3562_v49  ;;  %v985_v60 = vand.u32 2147483647, %v984_v26  ;;  %v3592_v59 = vand.u32 3, %v2966_v63 }
 0x101   :  { %v3594_v31 = vsub.s32 %v1069_v50, %v1072_v14  ;;  %v1126_v58 = vshrl.u32 %v1125_v27, 5  ;;  %v1130_v42 = vshll.u32 %v3922_v13, %v1127_v61  ;;  %v1131_v57 = vshrl.u32 %v3923_v38, %v1128_v21 }
 0x102   :  { %v988_v10 = vmul.f32 %v987_v24, %v985_v60  ;;  %v1133_v41 = vshll.u32 %v3923_v38, %v1127_v61  ;;  %v1134_v9 = vshrl.u32 %v3924_v17, %v1128_v21  ;;  %v3601_v45 = vrot.slane %v1227_v16, %v3573_v43 }
 0x103   :  { %v3605_v26 = vsel %vm896_vm12, %v899_v62, %v902_v1  ;;  %v1075_v63 = vsub.s32 0, %v3594_v31  ;;  %v1136_v50 = vshll.u32 %v3924_v17, %v1127_v61  ;;  %v1137_v27 = vshrl.u32 %v3915_v2, %v1128_v21 }
 0x104   :  { %v989_v14 = vxor.u32 2147483648, %v988_v10  ;;  %v1095_v54 = vsub.s32 4, %v1071_v20  ;;  %v1139_v24 = vshll.u32 %v3915_v2, %v1127_v61  ;;  %v3928_v38 = vmov 920167782  }
 0x105   :  { %v1140_v60 = vshrl.u32 %v3928_v38, %v1128_v21  ;;  %v3929_v11 = vand.u32 2147483647, %v2652_v51  ;;  %v2403_v56 = vmin.u32 %v1075_v63, %v3594_v31  ;;  %v1129_v62 = vshrl.u32 %v3922_v13, %v1128_v21 }
 0x106   :  { %v1132_v1 = vor.u32 %v1131_v57, %v1130_v42  ;;  %v1142_v17 = vshll.u32 %v3928_v38, %v1127_v61  ;;  %v990_v37 = vsel %vm907_vm2, %v989_v14, %v988_v10  ;;  %v1135_v25 = vor.u32 %v1134_v9, %v1133_v41 }
 0x107   :  { %vm3614_vm7 = vcmp.le.f32.partialorder %v3929_v11, 0.7853982  ;;  %v1141_v2 = vor.u32 %v1140_v60, %v1139_v24  ;;  %v1143_v28 = vshrl.u32 %v3917_v32, %v1128_v21  ;;  %v993_v11 = vsel %vm3472_vm15, %v3069_v5, %v990_v37 }
 0x108   :  { %v1077_v52 = vclz %v2403_v56  ;;  %v1138_v22 = vor.u32 %v1137_v27, %v1136_v50  ;;  %vm1145_vm9 = vcmp.lt.s32.totalorder %v1126_v58, 1  ;;  %2537 = vcosq.f32 %v993_v11 }
 0x109   :  { %v1096_v13 = vsel %vm1011_vm6, %v1095_v54, %v1071_v20  ;;  %v1144_v42 = vor.u32 %v1143_v28, %v1142_v17  ;;  %vm1146_vm10 = vcmp.lt.s32.totalorder %v1126_v58, 2  ;;  %2539 = vsinq.f32 %v993_v11 }
 0x10a   :  { %v2404_v61 = vadd.s32 4294967294, %v1077_v52  ;;  %vm1147_vm2 = vcmp.lt.s32.totalorder %v1126_v58, 3  ;;  %vm1148_vm11 = vcmp.lt.s32.totalorder %v1126_v58, 4  ;;  %vm1272_vm12 = vcmask 130048  }
 0x10b   :  { %v1149_v32 = vsel %vm1145_vm9, %v1129_v62, %v1132_v1  ;;  %v1150_v21 = vsel %vm1148_vm11, %v1138_v22, 2102212464  ;;  %v1153_v3 = vsel %vm1145_vm9, %v1132_v1, %v1135_v25  ;;  %v1154_v37 = vsel %vm1148_vm11, %v1141_v2, 920167782 }
 0x10c   :  { %vm3891_vm15 = vweird.f32 %v3063_v6  ;;  %vm2405_vm14 = vcmp.lt.s32.totalorder %v2404_v61, 0  ;;  %v1151_v57 = vsel %vm1147_vm2, %v1135_v25, %v1150_v21  ;;  %v1155_v54 = vsel %vm1147_vm2, %v1138_v22, %v1154_v37 }
 0x10d   :  { %v1157_v20 = vsel %vm1145_vm9, %v1135_v25, %v1138_v22  ;;  %v1080_v28 = vsel %vm2405_vm14, 0, %v2404_v61  ;;  %v1152_v52 = vsel %vm1146_vm10, %v1149_v32, %v1151_v57  ;;  %v1156_v10 = vsel %vm1146_vm10, %v1153_v3, %v1155_v54 }
 0x10e   :  { %v1158_v41 = vsel %vm1148_vm11, %v1144_v42, 1326507024  ;;  %v1081_v9 = vsub.s32 32, %v1080_v28  ;;  %v1082_v63 = vshll.u32 %v3594_v31, %v1080_v28  ;;  %v1085_v50 = vsub.s32 4294967266, %v1080_v28 }
 0x10f   :  { %v1159_v27 = vsel %vm1147_vm2, %v1141_v2, %v1158_v41  ;;  %v3641_v14 = vsel %vm3614_vm7, 0, %v1096_v13  ;;  %v3645_v22 = vmul.u32.u64.low %v3576_v4, %v1156_v10  ;;  %v3646_v25 = vmul.u32.u64.high %v3576_v4, %v1156_v10, %v3645_v22 }
 0x110   :  { %v1160_v24 = vsel %vm1146_vm10, %v1157_v20, %v1159_v27  ;;  %vm1000_vm4 = vcmp.lt.s32.totalorder %v3566_v33, 2  ;;  %v1083_v38 = vshrl.u32 %v3546_v19, %v1081_v9  ;;  %v1086_v60 = vadd.s32 127, %v1085_v50 }
 0x111   :  { %v3651_v31 = vmul.u32.u64.low %v3576_v4, %v1160_v24  ;;  %v3652_v56 = vmul.u32.u64.high %v3576_v4, %v1160_v24, %v3651_v31  ;;  %vm997_vm9 = vweird.f32 %v3069_v5  ;;  %v1168_v62 = vmul.u32 %v3576_v4, %v1152_v52 }
 0x112   :  { %v3932_v58 = vcombine.low %v3298_v35, %v3497_v30  ;;  %vm1371_vm10 = vcmp.lt.s32.totalorder %v3579_v44, 2  ;;  %vm1372_vm2 = vcmp.eq.s32.totalorder %v3579_v44, 0  ;;  %v1084_v17 = vor.u32 %v1083_v38, %v1082_v63 }
 0x113   :  { %v1087_v19 = vshll.u32 %v1086_v60, 23  ;;  %v3933_v2 = vxor.u32 2147483648, %v2952_v46  ;;  %vm1375_vm11 = vcmp.eq.s32.totalorder %v3579_v44, 2  ;;  %v1102_v13 = vadd.s32 3, %v3641_v14 }
 0x114   :  { %v1242_v1 = vrot.slane %v3932_v58, %v3573_v43  ;;  %v1171_v4 = vadd.s32 1, %v3646_v25  ;;  %v3934_v35 = vxor.u32 2147483648, %v2943_v40  ;;  %v1091_v32 = vcvt.s32.f32 %v1084_v17 }
 0x115   :  { %v1374_v11 = vsel %vm1372_vm2, %v2943_v40, %v3933_v2  ;;  %v1088_v61 = vor.u32 4788187, %v1087_v19  ;;  %v3673_v21 = vadd.s32 %v3645_v22, %v3652_v56  ;;  %vm1170_vm14 = vc.u32 %v3652_v56, %v3645_v22 }
 0x116   :  { %v1243_v42 = vcombine.low %v3601_v45, %v1242_v1  ;;  %v1377_v30 = vsel %vm1375_vm11, %v3934_v35, %v2952_v46  ;;  %vm1001_vm2 = vcmp.eq.s32.totalorder %v3566_v33, 0  ;;  %v1172_v3 = vsel %vm1170_vm14, %v1171_v4, %v3646_v25  ;;  %v3686_v46 = vpop.eup %2537  ;;  %v3938_v1 = vld [vmem:[#allocation9_spill] sm:$0xff]  ;;  %v3942_v4 = vld [vmem:[#allocation11_spill] sm:$0xff]  ;;  %v3943_v35 = vld [vmem:[#allocation10_spill] sm:$0xff] }
 0x117   :  { %v1244_v37 = vcombine.low %v3532_v15, %v3560_v8  ;;  %v1378_v40 = vsel %vm1371_vm10, %v1374_v11, %v1377_v30  ;;  %vm1004_vm11 = vcmp.eq.s32.totalorder %v3566_v33, 2  ;;  %v1089_v45 = vand.u32 2147483647, %v1088_v61  ;;  %v3693_v20 = vpop.eup %2539  ;;  %v3940_v11 = vld [vmem:[#allocation12_spill] sm:$0xff] }
 0x118   :  { %1273 = vst.msk [vmem:[%s3843_s1 + $0x2] sm:$0xff] %vm1272_vm12, %v1243_v42  ;;  %v1173_v57 = vadd.s32 %v1172_v3, %v1168_v62  ;;  %v3691_v54 = vsel %vm269_vm5, nan, %v1378_v40  ;;  %v904_v15 = vsel %vm3891_vm15, nan, %v3605_v26  ;;  %v1005_v8 = vxor.u32 2147483648, %v3686_v46 }
 0x119   :  { %v3699_v44 = vand.u32 3, %v1102_v13  ;;  %v1576_v28 = vand.u32 3, %v3037_v0  ;;  %v1002_v52 = vxor.u32 2147483648, %v3693_v20  ;;  %v1092_v10 = vmul.f32 %v1091_v32, %v1089_v45 }
 0x11a   :  { %v1174_v41 = vadd.s32 536870912, %v1173_v57  ;;  %vm1475_vm10 = vcmp.eq.s32.totalorder %v3592_v59, 0  ;;  %v1006_v48 = vsel %vm1004_vm11, %v1005_v8, %v3693_v20  ;;  %v1252_v9 = vrot.slane %v1244_v37, %v3573_v43  ;;  %v3945_v37 = vld [vmem:[#allocation13_spill] sm:$0xff] }
 0x11b   :  { %vm1478_vm5 = vcmp.eq.s32.totalorder %v3592_v59, 2  ;;  %v1679_v26 = vand.u32 3, %v3137_v53  ;;  %v1003_v0 = vsel %vm1001_vm2, %v3686_v46, %v1002_v52  ;;  %v1093_v63 = vxor.u32 2147483648, %v1092_v10 }
 0x11c   :  { %v3715_v50 = vshrl.u32 %v1174_v41, 30  ;;  %vm1474_vm14 = vcmp.lt.s32.totalorder %v3592_v59, 2  ;;  %v1007_v27 = vsel %vm1000_vm4, %v1003_v0, %v1006_v48  ;;  %v3935_v24 = vxor.u32 2147483648, %v3072_v23  ;;  %v3948_v48 = vld [vmem:[#allocation15_spill] sm:$0xff] }
 0x11d   :  { %vm1578_vm11 = vcmp.eq.s32.totalorder %v1576_v28, 0  ;;  %vm1581_vm15 = vcmp.eq.s32.totalorder %v1576_v28, 2  ;;  %v1008_v53 = vsel %vm997_vm9, nan, %v1007_v27  ;;  %v1094_v25 = vsel %vm1011_vm6, %v1093_v63, %v1092_v10 }
 0x11e   :  { %v1477_v22 = vsel %vm1475_vm10, %v3049_v18, %v3935_v24  ;;  %v1176_v38 = vshll.u32 %v3715_v50, 30  ;;  %v3936_v60 = vxor.u32 2147483648, %v3049_v18  ;;  %v1097_v33 = vsel %vm3614_vm7, %v2652_v51, %v1094_v25 }
 0x11f   :  { %v1245_v56 = vcombine.low %v904_v15, %v1008_v53  ;;  %vm1577_vm4 = vcmp.lt.s32.totalorder %v1576_v28, 2  ;;  %vm1681_vm2 = vcmp.eq.s32.totalorder %v1679_v26, 0  ;;  %2541 = vcosq.f32 %v1097_v33 }
 0x120   :  { %v1480_v31 = vsel %vm1478_vm5, %v3936_v60, %v3072_v23  ;;  %v3734_v62 = vsub.s32 %v1173_v57, %v1176_v38  ;;  %v3937_v58 = vxor.u32 2147483648, %v3148_v7  ;;  %v3939_v19 = vxor.u32 2147483648, %v3938_v1 }
 0x121   :  { %2543 = vsinq.f32 %v1097_v33  ;;  %v1259_v18 = vrot.slane %v1245_v56, %v3573_v43  ;;  %v1481_v23 = vsel %vm1474_vm14, %v1477_v22, %v1480_v31  ;;  %vm1680_vm6 = vcmp.lt.s32.totalorder %v1679_v26, 2 }
 0x122   :  { %v1580_v17 = vsel %vm1578_vm11, %v3938_v1, %v3937_v58  ;;  %v1583_v2 = vsel %vm1581_vm15, %v3939_v19, %v3148_v7  ;;  %v1179_v16 = vsub.s32 0, %v3734_v62  ;;  %v3941_v13 = vxor.u32 2147483648, %v3940_v11 }
 0x123   :  { %vm1684_vm7 = vcmp.eq.s32.totalorder %v1679_v26, 2  ;;  %v1782_v30 = vand.u32 3, %v3943_v35  ;;  %v1260_v61 = vcombine.low %v1252_v9, %v1259_v18  ;;  %v1584_v32 = vsel %vm1577_vm4, %v1580_v17, %v1583_v2  ;;  %v3950_v26 = vld [vmem:[#allocation14_spill] sm:$0xff] }
 0x124   :  { %v1683_v42 = vsel %vm1681_vm2, %v3942_v4, %v3941_v13  ;;  %v3944_v7 = vxor.u32 2147483648, %v3942_v4  ;;  %v1885_v40 = vand.u32 3, %v3945_v37  ;;  %v2407_v59 = vmin.u32 %v1179_v16, %v3734_v62 }
 0x125   :  { %v1988_v45 = vand.u32 3, %v3424_v29  ;;  %1274 = vst.msk [vmem:[%s3843_s1 + $0xa] sm:$0xff] %vm1272_vm12, %v1260_v61  ;;  %vm1783_vm15 = vcmp.lt.s32.totalorder %v1782_v30, 2  ;;  %vm1784_vm10 = vcmp.eq.s32.totalorder %v1782_v30, 0  ;;  %vm1787_vm5 = vcmp.eq.s32.totalorder %v1782_v30, 2 }
 0x126   :  { %v1686_v3 = vsel %vm1684_vm7, %v3944_v7, %v3940_v11  ;;  %vm1105_vm14 = vcmp.eq.s32.totalorder %v3699_v44, 0  ;;  %vm1108_vm11 = vcmp.eq.s32.totalorder %v3699_v44, 2  ;;  %v1181_v15 = vclz %v2407_v59 }
 0x127   :  { %v1687_v57 = vsel %vm1680_vm6, %v1683_v42, %v1686_v3  ;;  %v1482_v10 = vsel %vm373_vm0, nan, %v1481_v23  ;;  %v1585_v29 = vsel %vm477_vm1, nan, %v1584_v32  ;;  %vm1104_vm4 = vcmp.lt.s32.totalorder %v3699_v44, 2 }
 0x128   :  { %v3949_v9 = vxor.u32 2147483648, %v3948_v48  ;;  %v3951_v63 = vxor.u32 2147483648, %v3950_v26  ;;  %vm1887_vm2 = vcmp.eq.s32.totalorder %v1885_v40, 0  ;;  %vm1890_vm6 = vcmp.eq.s32.totalorder %v1885_v40, 2 }
 0x129   :  { %v2408_v24 = vadd.s32 4294967294, %v1181_v15  ;;  %v1688_v22 = vsel %vm581_vm8, nan, %v1687_v57  ;;  %vm1886_vm0 = vcmp.lt.s32.totalorder %v1885_v40, 2  ;;  %v3952_v38 = vxor.u32 2147483648, %v3441_v55 }
 0x12a   :  { %v1786_v0 = vsel %vm1784_vm10, %v3950_v26, %v3949_v9  ;;  %v1789_v27 = vsel %vm1787_vm5, %v3951_v63, %v3948_v48  ;;  %v3953_v31 = vxor.u32 2147483648, %v3420_v12  ;;  %vm1990_vm1 = vcmp.eq.s32.totalorder %v1988_v45, 0 }
 0x12b   :  { %v1790_v53 = vsel %vm1783_vm15, %v1786_v0, %v1789_v27  ;;  %v1889_v60 = vsel %vm1887_vm2, %v3420_v12, %v3952_v38  ;;  %vm2409_vm7 = vcmp.lt.s32.totalorder %v2408_v24, 0  ;;  %vm1989_vm10 = vcmp.lt.s32.totalorder %v1988_v45, 2 }
 0x12c   :  { %v1791_v25 = vsel %vm685_vm13, nan, %v1790_v53  ;;  %v1892_v33 = vsel %vm1890_vm6, %v3953_v31, %v3441_v55  ;;  %v3954_v56 = vxor.u32 2147483648, %v3562_v49  ;;  %vm1993_vm8 = vcmp.eq.s32.totalorder %v1988_v45, 2  ;;  %v2542_v23 = vpop.eup %2541 }
 0x12d   :  { %v1184_v58 = vsel %vm2409_vm7, 0, %v2408_v24  ;;  %v3955_v34 = vxor.u32 2147483648, %v3556_v47  ;;  %v2091_v17 = vand.u32 3, %v3543_v36  ;;  %v2194_v19 = vand.u32 3, %v3641_v14 }
 0x12e   :  { %v1992_v39 = vsel %vm1990_vm1, %v3556_v47, %v3954_v56  ;;  %v1185_v2 = vsub.s32 32, %v1184_v58  ;;  %v1186_v12 = vshll.u32 %v3734_v62, %v1184_v58  ;;  %v1189_v55 = vsub.s32 4294967266, %v1184_v58  ;;  %v2544_v11 = vpop.eup %2543 }
 0x12f   :  { %v1995_v1 = vsel %vm1993_vm8, %v3955_v34, %v3562_v49  ;;  %v1893_v18 = vsel %vm1886_vm0, %v1889_v60, %v1892_v33  ;;  %vm2092_vm13 = vcmp.lt.s32.totalorder %v2091_v17, 2  ;;  %vm2093_vm15 = vcmp.eq.s32.totalorder %v2091_v17, 0 }
 0x130   :  { %v1996_v16 = vsel %vm1989_vm10, %v1992_v39, %v1995_v1  ;;  %vm2096_vm5 = vcmp.eq.s32.totalorder %v2091_v17, 2  ;;  %v1109_v13 = vxor.u32 2147483648, %v2542_v23  ;;  %v1187_v47 = vshrl.u32 %v3673_v21, %v1185_v2 }
 0x131   :  { %v1190_v49 = vadd.s32 127, %v1189_v55  ;;  %v2095_v36 = vsel %vm2093_vm15, %v3686_v46, %v1002_v52  ;;  %v1106_v14 = vxor.u32 2147483648, %v2544_v11  ;;  %v2098_v62 = vsel %vm2096_vm5, %v1005_v8, %v3693_v20 }
 0x132   :  { %vm2195_vm2 = vcmp.lt.s32.totalorder %v2194_v19, 2  ;;  %vm2196_vm6 = vcmp.eq.s32.totalorder %v2194_v19, 0  ;;  %v1110_v4 = vsel %vm1108_vm11, %v1109_v13, %v2544_v11  ;;  %v1188_v42 = vor.u32 %v1187_v47, %v1186_v12 }
 0x133   :  { %v1191_v35 = vshll.u32 %v1190_v49, 23  ;;  %v2099_v30 = vsel %vm2092_vm13, %v2095_v36, %v2098_v62  ;;  %v1107_v21 = vsel %vm1105_vm14, %v2542_v23, %v1106_v14  ;;  %v1894_v32 = vsel %vm789_vm3, nan, %v1893_v18 }
 0x134   :  { %v2198_v52 = vsel %vm2196_vm6, %v2542_v23, %v1106_v14  ;;  %vm2199_vm0 = vcmp.eq.s32.totalorder %v2194_v19, 2  ;;  %v1111_v46 = vsel %vm1104_vm4, %v1107_v21, %v1110_v4  ;;  %v1195_v8 = vcvt.s32.f32 %v1188_v42 }
 0x135   :  { %v1192_v20 = vor.u32 4788187, %v1191_v35  ;;  %v2201_v7 = vsel %vm2199_vm0, %v1109_v13, %v2544_v11  ;;  %vm3957_vm1 = vweird.f32 %v3063_v6  ;;  %v2100_v37 = vsel %vm997_vm9, nan, %v2099_v30  ;;  %v3958_v6 = vld [vmem:[#allocation7_spill] sm:$0xff] }
 0x136   :  { %v1997_v3 = vsel %vm3957_vm1, nan, %v1996_v16  ;;  %v2202_v40 = vsel %vm2195_vm2, %v2198_v52, %v2201_v7  ;;  %v2317_v59 = vcombine.low %v3691_v54, %v1482_v10  ;;  %v2318_v57 = vcombine.low %v1585_v29, %v1688_v22 }
 0x137   :  { %v1193_v45 = vand.u32 2147483647, %v1192_v20  ;;  %v2334_v15 = vcombine.low %v1791_v25, %v1894_v32  ;;  %v2335_v48 = vcombine.low %v1997_v3, %v2100_v37  ;;  %vm1115_vm3 = vcmp.lt.s32.totalorder %v3958_v6, 0 }
 0x138   :  { %v2325_v28 = vrot.slane %v2317_v59, %v3573_v43  ;;  %v2332_v41 = vrot.slane %v2318_v57, %v3573_v43  ;;  %v1199_v5 = vsub.s32 4, %v3715_v50  ;;  %v3959_v26 = vand.u32 2147483647, %v3958_v6 }
 0x139   :  { %v1196_v44 = vmul.f32 %v1195_v8, %v1193_v45  ;;  %v2342_v9 = vrot.slane %v2334_v15, %v3573_v43  ;;  %v2349_v10 = vrot.slane %v2335_v48, %v3573_v43  ;;  %vm1101_vm4 = vweird.f32 %v2652_v51 }
 0x13a   :  { %vm1114_vm9 = vcmp.le.f32.partialorder %v3959_v26, 0.7853982  ;;  %v2333_v54 = vcombine.low %v2325_v28, %v2332_v41  ;;  %v1200_v27 = vsel %vm1115_vm3, %v1199_v5, %v3715_v50  ;;  %vm1205_vm15 = vweird.f32 %v3958_v6 }
 0x13b   :  { %v1197_v0 = vxor.u32 2147483648, %v1196_v44  ;;  %v2350_v63 = vcombine.low %v2342_v9, %v2349_v10  ;;  %v1202_v22 = vsel %vm1114_vm9, 0, %v1200_v27  ;;  %v1112_v58 = vsel %vm1101_vm4, nan, %v1111_v46 }
 0x13c   :  { %2362 = vst.msk [vmem:[%s3843_s1 + $0x16] sm:$0xff] %vm1272_vm12, %v2333_v54  ;;  %v1206_v53 = vadd.s32 3, %v1202_v22  ;;  %v2297_v38 = vand.u32 3, %v1202_v22  ;;  %v2203_v1 = vsel %vm1101_vm4, nan, %v2202_v40 }
 0x13d   :  { %v1198_v29 = vsel %vm1115_vm3, %v1197_v0, %v1196_v44  ;;  %2363 = vst.msk [vmem:[%s3843_s1 + $0x1e] sm:$0xff] %vm1272_vm12, %v2350_v63  ;;  %vm1275_vm12 = vcmask 125952  }
 0x13e   :  { %v1201_v24 = vsel %vm1114_vm9, %v3958_v6, %v1198_v29  ;;  %v1207_v25 = vand.u32 3, %v1206_v53  ;;  %vm2302_vm11 = vcmp.eq.s32.totalorder %v2297_v38, 2  ;;  %vm2299_vm10 = vcmp.eq.s32.totalorder %v2297_v38, 0 }
 0x13f   :  { %2545 = vcosq.f32 %v1201_v24  ;;  %vm2298_vm13 = vcmp.lt.s32.totalorder %v2297_v38, 2 }
 0x140   :  { %2547 = vsinq.f32 %v1201_v24  ;;  %vm1212_vm14 = vcmp.eq.s32.totalorder %v1207_v25, 2  ;;  %vm1209_vm7 = vcmp.eq.s32.totalorder %v1207_v25, 0  ;;  %vm1208_vm8 = vcmp.lt.s32.totalorder %v1207_v25, 2 }
 0x14c   :  { %v2546_v60 = vpop.eup %2545 }
 0x14d   :  { %v2548_v31 = vpop.eup %2547  ;;  %v1213_v50 = vxor.u32 2147483648, %v2546_v60 }
 0x14e   :  { %v1210_v33 = vxor.u32 2147483648, %v2548_v31 }
 0x14f   :  { %v1214_v56 = vsel %vm1212_vm14, %v1213_v50, %v2548_v31  ;;  %v2304_v39 = vsel %vm2302_vm11, %v1213_v50, %v2548_v31 }
 0x150   :  { %v1211_v34 = vsel %vm1209_vm7, %v2546_v60, %v1210_v33  ;;  %v2301_v17 = vsel %vm2299_vm10, %v2546_v60, %v1210_v33 }
 0x151   :  { %v1215_v19 = vsel %vm1208_vm8, %v1211_v34, %v1214_v56  ;;  %v2305_v2 = vsel %vm2298_vm13, %v2301_v17, %v2304_v39 }
 0x152   :  { %v1216_v12 = vsel %vm1205_vm15, nan, %v1215_v19  ;;  %v2306_v55 = vsel %vm1205_vm15, nan, %v2305_v2 }
 0x153   :  { %v1261_v18 = vcombine.low %v1112_v58, %v1216_v12  ;;  %v2351_v51 = vcombine.low %v2203_v1, %v2306_v55 }
 0x155   :  { %v1268_v23 = vrot.slane %v1261_v18, %v3573_v43  ;;  %v2358_v16 = vrot.slane %v2351_v51, %v3573_v43 }
 0x157   :  { %1276 = vst.msk [vmem:[%s3843_s1 + $0x12] sm:$0xf] %vm1275_vm12, %v1268_v23  ;;  %2364 = vst.msk [vmem:[%s3843_s1 + $0x26] sm:$0xf] %vm1275_vm12, %v2358_v16 }
 0x158   :  { %2369 = vsyncpa [#allocation3], 1 }

</bundles_post_ra>
